<compile_context>
chip_gen: v6e
topology: v6e:2x2x1
jax: 0.10.0
libtpu: 0.0.40
codegen_flags: <defaults>
</compile_context>

<pallas_src>
from functools import partial

import numpy as np
import jax
import jax.numpy as jnp
from jax import lax
from jax.experimental import pallas as pl
from jax.experimental.pallas import tpu as pltpu


def _round_up(x, m):
    return ((x + m - 1) // m) * m


_TAPS = [(dy, dx) for dy in (-1, 0, 1) for dx in (-1, 0, 1)]


# ----------------------------------------------------------------------------
# Fused kernel: conv3x3('same') -> train-mode BN -> ReLU, for the whole batch.
# ----------------------------------------------------------------------------
def conv_bn_relu_kernel(x_ref, mask_ref, w_ref, g_ref, b_ref, o_ref, patch_ref,
                        *, W, cin_p, count, eps):
    # x_ref    : (cin_p, NHW)   f32   activations, lane dim = N*H*W
    # mask_ref : (16, NHW)      f32   9 precomputed tap-validity masks (+pad)
    # w_ref    : (cout_p, 9*cin_p) bf16  packed weights (tap-major, chan-minor)
    # g_ref/b_ref : (cout_p, 1) f32   BN gamma / beta (padded rows are 0)
    # o_ref    : (cout_p, NHW)  f32   relu(BN(conv(x)))
    # patch_ref: (9*cin_p, NHW) bf16  VMEM scratch for the im2col patch matrix
    x = x_ref[...]
    m = mask_ref[...]                       # hoisted once; 9 static slices below
    NHW = x.shape[1]

    # Build the im2col patch matrix in place: tap t occupies rows
    # [t*cin_p, (t+1)*cin_p).  pltpu.roll (XLU) + precomputed mask handles the
    # 'same' halo; masks also zero any cross-image wrap since they repeat with
    # period H*W along the folded-batch lane axis.
    for t, (dy, dx) in enumerate(_TAPS):
        s = dy * W + dx                     # flat source offset: out[p]=x[p+s]
        shifted = x if s == 0 else pltpu.roll(x, shift=(-s) % NHW, axis=1)
        piece = shifted * m[t:t + 1, :]     # f32 mask-mul, then cast for MXU
        patch_ref[pl.ds(t * cin_p, cin_p), :] = piece.astype(jnp.bfloat16)

    # Single MXU dot (bf16 operands, f32 accumulation).
    acc = jnp.dot(w_ref[...], patch_ref[...],
                  preferred_element_type=jnp.float32)      # (cout_p, NHW) f32

    # Train-mode BatchNorm folded in-kernel (the whole batch is resident:
    # lane dim == N*H*W).  Conv bias is omitted: it cancels against the batch
    # mean exactly.  All stat math stays f32.
    # TODO(synk): E[x^2]-E[x]^2 is cancellation-prone at production N*H*W;
    # switch to a shifted / two-pass formulation before scaling up.
    inv_n = 1.0 / count
    mean = jnp.sum(acc, axis=1, keepdims=True) * inv_n              # (cout_p,1)
    var = jnp.maximum(jnp.sum(acc * acc, axis=1, keepdims=True) * inv_n
                      - mean * mean, 0.0)
    inv = g_ref[...] * lax.rsqrt(var + eps)                         # EUP rsqrt
    shift = b_ref[...] - mean * inv
    o_ref[...] = jnp.maximum(acc * inv + shift, 0.0).astype(o_ref.dtype)


def _conv_bn_relu(x, masks, w_mat, gamma, beta, *, W, eps):
    cin_p, NHW = x.shape
    cout_p, kdim = w_mat.shape
    return pl.pallas_call(
        partial(conv_bn_relu_kernel, W=W, cin_p=cin_p, count=float(NHW),
                eps=eps),
        out_shape=jax.ShapeDtypeStruct((cout_p, NHW), jnp.float32),
        grid=(1,),
        in_specs=[pl.BlockSpec((cin_p, NHW), lambda i: (0, 0)),
                  pl.BlockSpec((16, NHW), lambda i: (0, 0)),
                  pl.BlockSpec((cout_p, kdim), lambda i: (0, 0)),
                  # gamma/beta are tiny (cout_p,1) VMEM loads; negligible here.
                  pl.BlockSpec((cout_p, 1), lambda i: (0, 0)),
                  pl.BlockSpec((cout_p, 1), lambda i: (0, 0))],
        out_specs=pl.BlockSpec((cout_p, NHW), lambda i: (0, 0)),
        scratch_shapes=[pltpu.VMEM((kdim, NHW), jnp.bfloat16)],
        compiler_params=pltpu.CompilerParams(
            dimension_semantics=("arbitrary",)),
    )(x, masks, w_mat, gamma, beta)


# ----------------------------------------------------------------------------
# Trace-time glue
# ----------------------------------------------------------------------------
def _make_tap_masks(N, H, W):
    """(16, N*H*W) f32: rows 0..8 are the 3x3 tap validity masks for the
    batch-folded lane layout (period H*W); rows 9..15 are zero padding so the
    sublane extent is a multiple of 8/16."""
    HW = H * W
    pos = jnp.arange(N * HW, dtype=jnp.int32) % HW
    row = pos // W
    col = pos - row * W
    masks = []
    for dy, dx in _TAPS:
        v = ((row + dy >= 0) & (row + dy < H) &
             (col + dx >= 0) & (col + dx < W))
        masks.append(v.astype(jnp.float32))
    m = jnp.stack(masks, axis=0)                     # (9, NHW)
    return jnp.pad(m, ((0, 16 - 9), (0, 0)))         # (16, NHW)


def _pack_weights(w_hwio, cin_pad, cout_pad):
    """(3,3,Cin,Cout) HWIO -> bf16 (Cout_pad, 9*Cin_pad) matrix matching the
    im2col patch ordering (tap-major, channel-minor)."""
    kh, kw, cin, cout = w_hwio.shape
    w = jnp.transpose(w_hwio, (3, 0, 1, 2))          # (Cout, 3, 3, Cin)
    if cin_pad > cin:
        w = jnp.pad(w, ((0, 0), (0, 0), (0, 0), (0, cin_pad - cin)))
    w = w.reshape(cout, kh * kw * cin_pad)
    if cout_pad > cout:
        w = jnp.pad(w, ((0, cout_pad - cout), (0, 0)))
    return w.astype(jnp.bfloat16)


def _pad_col(v, n, fill):
    """1-D (C,) -> padded (n, 1) column."""
    c = v.shape[0]
    if n > c:
        v = jnp.concatenate([v, jnp.full((n - c,), fill, v.dtype)])
    return v[:, None].astype(jnp.float32)


def two_conv_block(x_nchw, params, eps=1e-5):
    N, cin, H, W = x_nchw.shape
    NHW = N * H * W
    assert NHW % 128 == 0, "fold-batch lane layout assumes N*H*W % 128 == 0"
    cmid = params["w1"].shape[3]
    cout = params["w2"].shape[3]
    # Conv input-channel pads are multiples of 16 so the per-tap slabs written
    # into the bf16 patch scratch stay aligned to the packed (16,128) tiling;
    # the final f32 output only needs sublane(8) alignment.
    c1p = _round_up(cin, 16)
    c2p = _round_up(cmid, 16)
    c3p = _round_up(cout, 8)

    # NCHW -> (C, N*H*W): one boundary transpose; lane dim is 128-aligned.
    x = jnp.transpose(x_nchw.astype(jnp.float32), (1, 0, 2, 3)).reshape(cin, NHW)
    if c1p != cin:
        x = jnp.pad(x, ((0, c1p - cin), (0, 0)))

    masks = _make_tap_masks(N, H, W)                 # shared by both convs

    # Conv biases are intentionally NOT used: training-mode BN subtracts the
    # batch mean, which cancels the bias exactly.
    w1_mat = _pack_weights(params["w1"], c1p, c2p)   # bf16 (c2p, 9*c1p)
    w2_mat = _pack_weights(params["w2"], c2p, c3p)   # bf16 (c3p, 9*c2p)
    # Padded channels get gamma=0, beta=0 -> inv-scale 0 (never 1/sqrt(eps)).
    g1 = _pad_col(params["g1"], c2p, 0.0)
    be1 = _pad_col(params["be1"], c2p, 0.0)
    g2 = _pad_col(params["g2"], c3p, 0.0)
    be2 = _pad_col(params["be2"], c3p, 0.0)

    z1 = _conv_bn_relu(x, masks, w1_mat, g1, be1, W=W, eps=eps)    # (c2p, NHW)
    z2 = _conv_bn_relu(z1, masks, w2_mat, g2, be2, W=W, eps=eps)   # (c3p, NHW)

    return jnp.transpose(z2[:cout].reshape(cout, N, H, W), (1, 0, 2, 3))


# ----------------------------------------------------------------------------
# Pure-JAX f32 reference (matches the PyTorch module, bias included)
# ----------------------------------------------------------------------------
def reference_block(x_nchw, params, eps=1e-5):
    x = jnp.transpose(x_nchw, (0, 2, 3, 1)).astype(jnp.float32)

    def conv_bn_relu(z, w, b, g, be):
        y = lax.conv_general_dilated(
            z, w, window_strides=(1, 1), padding="SAME",
            dimension_numbers=("NHWC", "HWIO", "NHWC")) + b
        mean = jnp.mean(y, axis=(0, 1, 2))
        var = jnp.mean((y - mean) ** 2, axis=(0, 1, 2))
        y = (y - mean) / jnp.sqrt(var + eps) * g + be
        return jnp.maximum(y, 0.0)

    z = conv_bn_relu(x, params["w1"], params["b1"], params["g1"], params["be1"])
    z = conv_bn_relu(z, params["w2"], params["b2"], params["g2"], params["be2"])
    return jnp.transpose(z, (0, 3, 1, 2))


# ----------------------------------------------------------------------------
def init_params(key, c_in, c_mid, c_out):
    """nn.Conv2d-style init.  Biases are only consumed by the reference; the
    Pallas path drops them (cancelled exactly by train-mode BatchNorm)."""
    ks = jax.random.split(key, 4)
    k1 = 1.0 / np.sqrt(c_in * 9)
    k2 = 1.0 / np.sqrt(c_mid * 9)
    return {
        "w1": jax.random.uniform(ks[0], (3, 3, c_in, c_mid), jnp.float32, -k1, k1),
        "b1": jax.random.uniform(ks[1], (c_mid,), jnp.float32, -k1, k1),
        "g1": jnp.ones((c_mid,), jnp.float32),
        "be1": jnp.zeros((c_mid,), jnp.float32),
        "w2": jax.random.uniform(ks[2], (3, 3, c_mid, c_out), jnp.float32, -k2, k2),
        "b2": jax.random.uniform(ks[3], (c_out,), jnp.float32, -k2, k2),
        "g2": jnp.ones((c_out,), jnp.float32),
        "be2": jnp.zeros((c_out,), jnp.float32),
    }


if __name__ == "__main__":
    key = jax.random.PRNGKey(0)
    k_x, k_p = jax.random.split(key)

    N, C_IN, C_MID, C_OUT, H, W = 2, 4, 8, 4, 16, 16
    x = jax.random.normal(k_x, (N, C_IN, H, W), jnp.float32)
    params = init_params(k_p, C_IN, C_MID, C_OUT)

    fwd = jax.jit(two_conv_block)
    out = jax.block_until_ready(fwd(x, params))
    ref = jax.block_until_ready(reference_block(x, params))

    assert out.shape == (N, C_OUT, H, W)
    # Tolerance reflects bf16 MXU operands (accumulation and BN math are f32);
    # any structural bug (wrong tap/mask/BN) would produce O(1) errors.
    np.testing.assert_allclose(np.asarray(out), np.asarray(ref),
                               rtol=5e-2, atol=5e-2)
    print("KERNEL_OK")
</pallas_src>

<mosaic_0001>
module attributes {stable_mosaic.version = 11 : i64} {
  func.func @conv_bn_relu_kernel(%arg0: i32, %arg1: memref<16x512xf32, #tpu.memory_space<vmem>>, %arg2: memref<16x512xf32, #tpu.memory_space<vmem>>, %arg3: memref<16x144xbf16, #tpu.memory_space<vmem>>, %arg4: memref<16x1xf32, #tpu.memory_space<vmem>>, %arg5: memref<16x1xf32, #tpu.memory_space<vmem>>, %arg6: memref<16x512xf32, #tpu.memory_space<vmem>>, %arg7: memref<144x512xbf16, #tpu.memory_space<vmem>>) attributes {dimension_semantics = [#tpu.dimension_semantics<arbitrary>], iteration_bounds = array<i64: 1>, scalar_prefetch = 0 : i64, scratch_operands = 1 : i64, tpu.core_type = #tpu.core_type<tc>, window_params = [{pipeline_mode = #tpu.pipeline_mode<synchronous>, transform_indices = @transform_0, window_bounds = array<i64: 16, 512>}, {pipeline_mode = #tpu.pipeline_mode<synchronous>, transform_indices = @transform_1, window_bounds = array<i64: 16, 512>}, {pipeline_mode = #tpu.pipeline_mode<synchronous>, transform_indices = @transform_2, window_bounds = array<i64: 16, 144>}, {pipeline_mode = #tpu.pipeline_mode<synchronous>, transform_indices = @transform_3, window_bounds = array<i64: 16, 1>}, {pipeline_mode = #tpu.pipeline_mode<synchronous>, transform_indices = @transform_4, window_bounds = array<i64: 16, 1>}, {pipeline_mode = #tpu.pipeline_mode<synchronous>, transform_indices = @transform_5, window_bounds = array<i64: 16, 512>}]} {
    %c0 = arith.constant 0 : index
    %c0_0 = arith.constant 0 : index
    %0 = vector.load %arg1[%c0, %c0_0] : memref<16x512xf32, #tpu.memory_space<vmem>>, vector<16x512xf32>
    %c0_1 = arith.constant 0 : index
    %c0_2 = arith.constant 0 : index
    %1 = vector.load %arg2[%c0_1, %c0_2] : memref<16x512xf32, #tpu.memory_space<vmem>>, vector<16x512xf32>
    %c17_i32 = arith.constant 17 : i32
    %2 = tpu.dynamic_rotate %0 by %c17_i32 dim 1 : vector<16x512xf32>, i32 -> vector<16x512xf32>
    %3 = vector.extract_strided_slice %1 {offsets = [0, 0], sizes = [1, 512], strides = [1, 1]} : vector<16x512xf32> to vector<1x512xf32>
    %4 = vector.broadcast %3 : vector<1x512xf32> to vector<16x512xf32>
    %5 = arith.mulf %2, %4 : vector<16x512xf32>
    %6 = arith.truncf %5 : vector<16x512xf32> to vector<16x512xbf16>
    %c0_3 = arith.constant 0 : index
    %c0_4 = arith.constant 0 : index
    %7 = vector.load %arg7[%c0_3, %c0_4] : memref<144x512xbf16, #tpu.memory_space<vmem>>, vector<16x512xbf16>
    tpu.vector_store %arg7[%c0_3, %c0_4], %6 {strides = array<i32>} : memref<144x512xbf16, #tpu.memory_space<vmem>>, vector<16x512xbf16>,
    %c16_i32 = arith.constant 16 : i32
    %8 = tpu.dynamic_rotate %0 by %c16_i32 dim 1 : vector<16x512xf32>, i32 -> vector<16x512xf32>
    %9 = vector.extract_strided_slice %1 {offsets = [1, 0], sizes = [1, 512], strides = [1, 1]} : vector<16x512xf32> to vector<1x512xf32>
    %10 = vector.broadcast %9 : vector<1x512xf32> to vector<16x512xf32>
    %11 = arith.mulf %8, %10 : vector<16x512xf32>
    %12 = arith.truncf %11 : vector<16x512xf32> to vector<16x512xbf16>
    %c16 = arith.constant 16 : index
    %c0_5 = arith.constant 0 : index
    %13 = vector.load %arg7[%c16, %c0_5] : memref<144x512xbf16, #tpu.memory_space<vmem>>, vector<16x512xbf16>
    tpu.vector_store %arg7[%c16, %c0_5], %12 {strides = array<i32>} : memref<144x512xbf16, #tpu.memory_space<vmem>>, vector<16x512xbf16>,
    %c15_i32 = arith.constant 15 : i32
    %14 = tpu.dynamic_rotate %0 by %c15_i32 dim 1 : vector<16x512xf32>, i32 -> vector<16x512xf32>
    %15 = vector.extract_strided_slice %1 {offsets = [2, 0], sizes = [1, 512], strides = [1, 1]} : vector<16x512xf32> to vector<1x512xf32>
    %16 = vector.broadcast %15 : vector<1x512xf32> to vector<16x512xf32>
    %17 = arith.mulf %14, %16 : vector<16x512xf32>
    %18 = arith.truncf %17 : vector<16x512xf32> to vector<16x512xbf16>
    %c32 = arith.constant 32 : index
    %c0_6 = arith.constant 0 : index
    %19 = vector.load %arg7[%c32, %c0_6] : memref<144x512xbf16, #tpu.memory_space<vmem>>, vector<16x512xbf16>
    tpu.vector_store %arg7[%c32, %c0_6], %18 {strides = array<i32>} : memref<144x512xbf16, #tpu.memory_space<vmem>>, vector<16x512xbf16>,
    %c1_i32 = arith.constant 1 : i32
    %20 = tpu.dynamic_rotate %0 by %c1_i32 dim 1 : vector<16x512xf32>, i32 -> vector<16x512xf32>
    %21 = vector.extract_strided_slice %1 {offsets = [3, 0], sizes = [1, 512], strides = [1, 1]} : vector<16x512xf32> to vector<1x512xf32>
    %22 = vector.broadcast %21 : vector<1x512xf32> to vector<16x512xf32>
    %23 = arith.mulf %20, %22 : vector<16x512xf32>
    %24 = arith.truncf %23 : vector<16x512xf32> to vector<16x512xbf16>
    %c48 = arith.constant 48 : index
    %c0_7 = arith.constant 0 : index
    %25 = vector.load %arg7[%c48, %c0_7] : memref<144x512xbf16, #tpu.memory_space<vmem>>, vector<16x512xbf16>
    tpu.vector_store %arg7[%c48, %c0_7], %24 {strides = array<i32>} : memref<144x512xbf16, #tpu.memory_space<vmem>>, vector<16x512xbf16>,
    %26 = vector.extract_strided_slice %1 {offsets = [4, 0], sizes = [1, 512], strides = [1, 1]} : vector<16x512xf32> to vector<1x512xf32>
    %27 = vector.broadcast %26 : vector<1x512xf32> to vector<16x512xf32>
    %28 = arith.mulf %0, %27 : vector<16x512xf32>
    %29 = arith.truncf %28 : vector<16x512xf32> to vector<16x512xbf16>
    %c64 = arith.constant 64 : index
    %c0_8 = arith.constant 0 : index
    %30 = vector.load %arg7[%c64, %c0_8] : memref<144x512xbf16, #tpu.memory_space<vmem>>, vector<16x512xbf16>
    tpu.vector_store %arg7[%c64, %c0_8], %29 {strides = array<i32>} : memref<144x512xbf16, #tpu.memory_space<vmem>>, vector<16x512xbf16>,
    %c511_i32 = arith.constant 511 : i32
    %31 = tpu.dynamic_rotate %0 by %c511_i32 dim 1 : vector<16x512xf32>, i32 -> vector<16x512xf32>
    %32 = vector.extract_strided_slice %1 {offsets = [5, 0], sizes = [1, 512], strides = [1, 1]} : vector<16x512xf32> to vector<1x512xf32>
    %33 = vector.broadcast %32 : vector<1x512xf32> to vector<16x512xf32>
    %34 = arith.mulf %31, %33 : vector<16x512xf32>
    %35 = arith.truncf %34 : vector<16x512xf32> to vector<16x512xbf16>
    %c80 = arith.constant 80 : index
    %c0_9 = arith.constant 0 : index
    %36 = vector.load %arg7[%c80, %c0_9] : memref<144x512xbf16, #tpu.memory_space<vmem>>, vector<16x512xbf16>
    tpu.vector_store %arg7[%c80, %c0_9], %35 {strides = array<i32>} : memref<144x512xbf16, #tpu.memory_space<vmem>>, vector<16x512xbf16>,
    %c497_i32 = arith.constant 497 : i32
    %37 = tpu.dynamic_rotate %0 by %c497_i32 dim 1 : vector<16x512xf32>, i32 -> vector<16x512xf32>
    %38 = vector.extract_strided_slice %1 {offsets = [6, 0], sizes = [1, 512], strides = [1, 1]} : vector<16x512xf32> to vector<1x512xf32>
    %39 = vector.broadcast %38 : vector<1x512xf32> to vector<16x512xf32>
    %40 = arith.mulf %37, %39 : vector<16x512xf32>
    %41 = arith.truncf %40 : vector<16x512xf32> to vector<16x512xbf16>
    %c96 = arith.constant 96 : index
    %c0_10 = arith.constant 0 : index
    %42 = vector.load %arg7[%c96, %c0_10] : memref<144x512xbf16, #tpu.memory_space<vmem>>, vector<16x512xbf16>
    tpu.vector_store %arg7[%c96, %c0_10], %41 {strides = array<i32>} : memref<144x512xbf16, #tpu.memory_space<vmem>>, vector<16x512xbf16>,
    %c496_i32 = arith.constant 496 : i32
    %43 = tpu.dynamic_rotate %0 by %c496_i32 dim 1 : vector<16x512xf32>, i32 -> vector<16x512xf32>
    %44 = vector.extract_strided_slice %1 {offsets = [7, 0], sizes = [1, 512], strides = [1, 1]} : vector<16x512xf32> to vector<1x512xf32>
    %45 = vector.broadcast %44 : vector<1x512xf32> to vector<16x512xf32>
    %46 = arith.mulf %43, %45 : vector<16x512xf32>
    %47 = arith.truncf %46 : vector<16x512xf32> to vector<16x512xbf16>
    %c112 = arith.constant 112 : index
    %c0_11 = arith.constant 0 : index
    %48 = vector.load %arg7[%c112, %c0_11] : memref<144x512xbf16, #tpu.memory_space<vmem>>, vector<16x512xbf16>
    tpu.vector_store %arg7[%c112, %c0_11], %47 {strides = array<i32>} : memref<144x512xbf16, #tpu.memory_space<vmem>>, vector<16x512xbf16>,
    %c495_i32 = arith.constant 495 : i32
    %49 = tpu.dynamic_rotate %0 by %c495_i32 dim 1 : vector<16x512xf32>, i32 -> vector<16x512xf32>
    %50 = vector.extract_strided_slice %1 {offsets = [8, 0], sizes = [1, 512], strides = [1, 1]} : vector<16x512xf32> to vector<1x512xf32>
    %51 = vector.broadcast %50 : vector<1x512xf32> to vector<16x512xf32>
    %52 = arith.mulf %49, %51 : vector<16x512xf32>
    %53 = arith.truncf %52 : vector<16x512xf32> to vector<16x512xbf16>
    %c128 = arith.constant 128 : index
    %c0_12 = arith.constant 0 : index
    %54 = vector.load %arg7[%c128, %c0_12] : memref<144x512xbf16, #tpu.memory_space<vmem>>, vector<16x512xbf16>
    tpu.vector_store %arg7[%c128, %c0_12], %53 {strides = array<i32>} : memref<144x512xbf16, #tpu.memory_space<vmem>>, vector<16x512xbf16>,
    %c0_13 = arith.constant 0 : index
    %c0_14 = arith.constant 0 : index
    %55 = vector.load %arg3[%c0_13, %c0_14] : memref<16x144xbf16, #tpu.memory_space<vmem>>, vector<16x144xbf16>
    %c0_15 = arith.constant 0 : index
    %c0_16 = arith.constant 0 : index
    %56 = vector.load %arg7[%c0_15, %c0_16] : memref<144x512xbf16, #tpu.memory_space<vmem>>, vector<144x512xbf16>
    %cst = arith.constant dense<0.000000e+00> : vector<16x512xf32>
    %57 = tpu.matmul %55, %56, %cst {dimension_numbers = #tpu.dot_dimension_numbers<[1], [0], [0], [1], [0, 0, 1, 1], [], []>} : vector<16x144xbf16>, vector<144x512xbf16>, vector<16x512xf32> -> vector<16x512xf32>
    %cst_17 = arith.constant dense<0.000000e+00> : vector<16xf32>
    %58 = vector.multi_reduction <add>, %57, %cst_17 [1] : vector<16x512xf32> to vector<16xf32>
    %59 = vector.shape_cast %58 : vector<16xf32> to vector<16x1xf32>
    %cst_18 = arith.constant 0.001953125 : f32
    %60 = vector.broadcast %cst_18 : f32 to vector<16x1xf32>
    %61 = arith.mulf %59, %60 : vector<16x1xf32>
    %62 = arith.mulf %57, %57 : vector<16x512xf32>
    %cst_19 = arith.constant dense<0.000000e+00> : vector<16xf32>
    %63 = vector.multi_reduction <add>, %62, %cst_19 [1] : vector<16x512xf32> to vector<16xf32>
    %64 = vector.shape_cast %63 : vector<16xf32> to vector<16x1xf32>
    %cst_20 = arith.constant 0.001953125 : f32
    %65 = vector.broadcast %cst_20 : f32 to vector<16x1xf32>
    %66 = arith.mulf %64, %65 : vector<16x1xf32>
    %67 = arith.mulf %61, %61 : vector<16x1xf32>
    %68 = arith.subf %66, %67 : vector<16x1xf32>
    %cst_21 = arith.constant 0.000000e+00 : f32
    %69 = vector.broadcast %cst_21 : f32 to vector<16x1xf32>
    %70 = arith.maximumf %68, %69 : vector<16x1xf32>
    %c0_22 = arith.constant 0 : index
    %c0_23 = arith.constant 0 : index
    %71 = vector.load %arg4[%c0_22, %c0_23] : memref<16x1xf32, #tpu.memory_space<vmem>>, vector<16x1xf32>
    %cst_24 = arith.constant 9.99999974E-6 : f32
    %72 = vector.broadcast %cst_24 : f32 to vector<16x1xf32>
    %73 = arith.addf %70, %72 : vector<16x1xf32>
    %74 = math.rsqrt %73 : vector<16x1xf32>
    %75 = arith.mulf %71, %74 : vector<16x1xf32>
    %c0_25 = arith.constant 0 : index
    %c0_26 = arith.constant 0 : index
    %76 = vector.load %arg5[%c0_25, %c0_26] : memref<16x1xf32, #tpu.memory_space<vmem>>, vector<16x1xf32>
    %77 = arith.mulf %61, %75 : vector<16x1xf32>
    %78 = arith.subf %76, %77 : vector<16x1xf32>
    %79 = vector.broadcast %75 : vector<16x1xf32> to vector<16x512xf32>
    %80 = arith.mulf %57, %79 : vector<16x512xf32>
    %81 = vector.broadcast %78 : vector<16x1xf32> to vector<16x512xf32>
    %82 = arith.addf %80, %81 : vector<16x512xf32>
    %cst_27 = arith.constant 0.000000e+00 : f32
    %83 = vector.broadcast %cst_27 : f32 to vector<16x512xf32>
    %84 = arith.maximumf %82, %83 : vector<16x512xf32>
    %c0_28 = arith.constant 0 : index
    %c0_29 = arith.constant 0 : index
    %85 = vector.load %arg6[%c0_28, %c0_29] : memref<16x512xf32, #tpu.memory_space<vmem>>, vector<16x512xf32>
    tpu.vector_store %arg6[%c0_28, %c0_29], %84 {strides = array<i32>} : memref<16x512xf32, #tpu.memory_space<vmem>>, vector<16x512xf32>,
    return
  }
  func.func @transform_0(%arg0: i32) -> (i32, i32) {
    %c0_i32 = arith.constant 0 : i32
    %c0_i32_0 = arith.constant 0 : i32
    %c0_i32_1 = arith.constant 0 : i32
    return %c0_i32, %c0_i32_0 : i32, i32
  }
  func.func @transform_1(%arg0: i32) -> (i32, i32) {
    %c0_i32 = arith.constant 0 : i32
    %c0_i32_0 = arith.constant 0 : i32
    %c0_i32_1 = arith.constant 0 : i32
    return %c0_i32, %c0_i32_0 : i32, i32
  }
  func.func @transform_2(%arg0: i32) -> (i32, i32) {
    %c0_i32 = arith.constant 0 : i32
    %c0_i32_0 = arith.constant 0 : i32
    %c0_i32_1 = arith.constant 0 : i32
    return %c0_i32, %c0_i32_0 : i32, i32
  }
  func.func @transform_3(%arg0: i32) -> (i32, i32) {
    %c0_i32 = arith.constant 0 : i32
    %c0_i32_0 = arith.constant 0 : i32
    %c0_i32_1 = arith.constant 0 : i32
    return %c0_i32, %c0_i32_0 : i32, i32
  }
  func.func @transform_4(%arg0: i32) -> (i32, i32) {
    %c0_i32 = arith.constant 0 : i32
    %c0_i32_0 = arith.constant 0 : i32
    %c0_i32_1 = arith.constant 0 : i32
    return %c0_i32, %c0_i32_0 : i32, i32
  }
  func.func @transform_5(%arg0: i32) -> (i32, i32) {
    %c0_i32 = arith.constant 0 : i32
    %c0_i32_0 = arith.constant 0 : i32
    %c0_i32_1 = arith.constant 0 : i32
    return %c0_i32, %c0_i32_0 : i32, i32
  }
}

module attributes {stable_mosaic.version = 11 : i64} {
  func.func @conv_bn_relu_kernel(%arg0: i32, %arg1: memref<16x512xf32, #tpu.memory_space<vmem>>, %arg2: memref<16x512xf32, #tpu.memory_space<vmem>>, %arg3: memref<8x144xbf16, #tpu.memory_space<vmem>>, %arg4: memref<8x1xf32, #tpu.memory_space<vmem>>, %arg5: memref<8x1xf32, #tpu.memory_space<vmem>>, %arg6: memref<8x512xf32, #tpu.memory_space<vmem>>, %arg7: memref<144x512xbf16, #tpu.memory_space<vmem>>) attributes {dimension_semantics = [#tpu.dimension_semantics<arbitrary>], iteration_bounds = array<i64: 1>, scalar_prefetch = 0 : i64, scratch_operands = 1 : i64, tpu.core_type = #tpu.core_type<tc>, window_params = [{pipeline_mode = #tpu.pipeline_mode<synchronous>, transform_indices = @transform_0, window_bounds = array<i64: 16, 512>}, {pipeline_mode = #tpu.pipeline_mode<synchronous>, transform_indices = @transform_1, window_bounds = array<i64: 16, 512>}, {pipeline_mode = #tpu.pipeline_mode<synchronous>, transform_indices = @transform_2, window_bounds = array<i64: 8, 144>}, {pipeline_mode = #tpu.pipeline_mode<synchronous>, transform_indices = @transform_3, window_bounds = array<i64: 8, 1>}, {pipeline_mode = #tpu.pipeline_mode<synchronous>, transform_indices = @transform_4, window_bounds = array<i64: 8, 1>}, {pipeline_mode = #tpu.pipeline_mode<synchronous>, transform_indices = @transform_5, window_bounds = array<i64: 8, 512>}]} {
    %c0 = arith.constant 0 : index
    %c0_0 = arith.constant 0 : index
    %0 = vector.load %arg1[%c0, %c0_0] : memref<16x512xf32, #tpu.memory_space<vmem>>, vector<16x512xf32>
    %c0_1 = arith.constant 0 : index
    %c0_2 = arith.constant 0 : index
    %1 = vector.load %arg2[%c0_1, %c0_2] : memref<16x512xf32, #tpu.memory_space<vmem>>, vector<16x512xf32>
    %c17_i32 = arith.constant 17 : i32
    %2 = tpu.dynamic_rotate %0 by %c17_i32 dim 1 : vector<16x512xf32>, i32 -> vector<16x512xf32>
    %3 = vector.extract_strided_slice %1 {offsets = [0, 0], sizes = [1, 512], strides = [1, 1]} : vector<16x512xf32> to vector<1x512xf32>
    %4 = vector.broadcast %3 : vector<1x512xf32> to vector<16x512xf32>
    %5 = arith.mulf %2, %4 : vector<16x512xf32>
    %6 = arith.truncf %5 : vector<16x512xf32> to vector<16x512xbf16>
    %c0_3 = arith.constant 0 : index
    %c0_4 = arith.constant 0 : index
    %7 = vector.load %arg7[%c0_3, %c0_4] : memref<144x512xbf16, #tpu.memory_space<vmem>>, vector<16x512xbf16>
    tpu.vector_store %arg7[%c0_3, %c0_4], %6 {strides = array<i32>} : memref<144x512xbf16, #tpu.memory_space<vmem>>, vector<16x512xbf16>,
    %c16_i32 = arith.constant 16 : i32
    %8 = tpu.dynamic_rotate %0 by %c16_i32 dim 1 : vector<16x512xf32>, i32 -> vector<16x512xf32>
    %9 = vector.extract_strided_slice %1 {offsets = [1, 0], sizes = [1, 512], strides = [1, 1]} : vector<16x512xf32> to vector<1x512xf32>
    %10 = vector.broadcast %9 : vector<1x512xf32> to vector<16x512xf32>
    %11 = arith.mulf %8, %10 : vector<16x512xf32>
    %12 = arith.truncf %11 : vector<16x512xf32> to vector<16x512xbf16>
    %c16 = arith.constant 16 : index
    %c0_5 = arith.constant 0 : index
    %13 = vector.load %arg7[%c16, %c0_5] : memref<144x512xbf16, #tpu.memory_space<vmem>>, vector<16x512xbf16>
    tpu.vector_store %arg7[%c16, %c0_5], %12 {strides = array<i32>} : memref<144x512xbf16, #tpu.memory_space<vmem>>, vector<16x512xbf16>,
    %c15_i32 = arith.constant 15 : i32
    %14 = tpu.dynamic_rotate %0 by %c15_i32 dim 1 : vector<16x512xf32>, i32 -> vector<16x512xf32>
    %15 = vector.extract_strided_slice %1 {offsets = [2, 0], sizes = [1, 512], strides = [1, 1]} : vector<16x512xf32> to vector<1x512xf32>
    %16 = vector.broadcast %15 : vector<1x512xf32> to vector<16x512xf32>
    %17 = arith.mulf %14, %16 : vector<16x512xf32>
    %18 = arith.truncf %17 : vector<16x512xf32> to vector<16x512xbf16>
    %c32 = arith.constant 32 : index
    %c0_6 = arith.constant 0 : index
    %19 = vector.load %arg7[%c32, %c0_6] : memref<144x512xbf16, #tpu.memory_space<vmem>>, vector<16x512xbf16>
    tpu.vector_store %arg7[%c32, %c0_6], %18 {strides = array<i32>} : memref<144x512xbf16, #tpu.memory_space<vmem>>, vector<16x512xbf16>,
    %c1_i32 = arith.constant 1 : i32
    %20 = tpu.dynamic_rotate %0 by %c1_i32 dim 1 : vector<16x512xf32>, i32 -> vector<16x512xf32>
    %21 = vector.extract_strided_slice %1 {offsets = [3, 0], sizes = [1, 512], strides = [1, 1]} : vector<16x512xf32> to vector<1x512xf32>
    %22 = vector.broadcast %21 : vector<1x512xf32> to vector<16x512xf32>
    %23 = arith.mulf %20, %22 : vector<16x512xf32>
    %24 = arith.truncf %23 : vector<16x512xf32> to vector<16x512xbf16>
    %c48 = arith.constant 48 : index
    %c0_7 = arith.constant 0 : index
    %25 = vector.load %arg7[%c48, %c0_7] : memref<144x512xbf16, #tpu.memory_space<vmem>>, vector<16x512xbf16>
    tpu.vector_store %arg7[%c48, %c0_7], %24 {strides = array<i32>} : memref<144x512xbf16, #tpu.memory_space<vmem>>, vector<16x512xbf16>,
    %26 = vector.extract_strided_slice %1 {offsets = [4, 0], sizes = [1, 512], strides = [1, 1]} : vector<16x512xf32> to vector<1x512xf32>
    %27 = vector.broadcast %26 : vector<1x512xf32> to vector<16x512xf32>
    %28 = arith.mulf %0, %27 : vector<16x512xf32>
    %29 = arith.truncf %28 : vector<16x512xf32> to vector<16x512xbf16>
    %c64 = arith.constant 64 : index
    %c0_8 = arith.constant 0 : index
    %30 = vector.load %arg7[%c64, %c0_8] : memref<144x512xbf16, #tpu.memory_space<vmem>>, vector<16x512xbf16>
    tpu.vector_store %arg7[%c64, %c0_8], %29 {strides = array<i32>} : memref<144x512xbf16, #tpu.memory_space<vmem>>, vector<16x512xbf16>,
    %c511_i32 = arith.constant 511 : i32
    %31 = tpu.dynamic_rotate %0 by %c511_i32 dim 1 : vector<16x512xf32>, i32 -> vector<16x512xf32>
    %32 = vector.extract_strided_slice %1 {offsets = [5, 0], sizes = [1, 512], strides = [1, 1]} : vector<16x512xf32> to vector<1x512xf32>
    %33 = vector.broadcast %32 : vector<1x512xf32> to vector<16x512xf32>
    %34 = arith.mulf %31, %33 : vector<16x512xf32>
    %35 = arith.truncf %34 : vector<16x512xf32> to vector<16x512xbf16>
    %c80 = arith.constant 80 : index
    %c0_9 = arith.constant 0 : index
    %36 = vector.load %arg7[%c80, %c0_9] : memref<144x512xbf16, #tpu.memory_space<vmem>>, vector<16x512xbf16>
    tpu.vector_store %arg7[%c80, %c0_9], %35 {strides = array<i32>} : memref<144x512xbf16, #tpu.memory_space<vmem>>, vector<16x512xbf16>,
    %c497_i32 = arith.constant 497 : i32
    %37 = tpu.dynamic_rotate %0 by %c497_i32 dim 1 : vector<16x512xf32>, i32 -> vector<16x512xf32>
    %38 = vector.extract_strided_slice %1 {offsets = [6, 0], sizes = [1, 512], strides = [1, 1]} : vector<16x512xf32> to vector<1x512xf32>
    %39 = vector.broadcast %38 : vector<1x512xf32> to vector<16x512xf32>
    %40 = arith.mulf %37, %39 : vector<16x512xf32>
    %41 = arith.truncf %40 : vector<16x512xf32> to vector<16x512xbf16>
    %c96 = arith.constant 96 : index
    %c0_10 = arith.constant 0 : index
    %42 = vector.load %arg7[%c96, %c0_10] : memref<144x512xbf16, #tpu.memory_space<vmem>>, vector<16x512xbf16>
    tpu.vector_store %arg7[%c96, %c0_10], %41 {strides = array<i32>} : memref<144x512xbf16, #tpu.memory_space<vmem>>, vector<16x512xbf16>,
    %c496_i32 = arith.constant 496 : i32
    %43 = tpu.dynamic_rotate %0 by %c496_i32 dim 1 : vector<16x512xf32>, i32 -> vector<16x512xf32>
    %44 = vector.extract_strided_slice %1 {offsets = [7, 0], sizes = [1, 512], strides = [1, 1]} : vector<16x512xf32> to vector<1x512xf32>
    %45 = vector.broadcast %44 : vector<1x512xf32> to vector<16x512xf32>
    %46 = arith.mulf %43, %45 : vector<16x512xf32>
    %47 = arith.truncf %46 : vector<16x512xf32> to vector<16x512xbf16>
    %c112 = arith.constant 112 : index
    %c0_11 = arith.constant 0 : index
    %48 = vector.load %arg7[%c112, %c0_11] : memref<144x512xbf16, #tpu.memory_space<vmem>>, vector<16x512xbf16>
    tpu.vector_store %arg7[%c112, %c0_11], %47 {strides = array<i32>} : memref<144x512xbf16, #tpu.memory_space<vmem>>, vector<16x512xbf16>,
    %c495_i32 = arith.constant 495 : i32
    %49 = tpu.dynamic_rotate %0 by %c495_i32 dim 1 : vector<16x512xf32>, i32 -> vector<16x512xf32>
    %50 = vector.extract_strided_slice %1 {offsets = [8, 0], sizes = [1, 512], strides = [1, 1]} : vector<16x512xf32> to vector<1x512xf32>
    %51 = vector.broadcast %50 : vector<1x512xf32> to vector<16x512xf32>
    %52 = arith.mulf %49, %51 : vector<16x512xf32>
    %53 = arith.truncf %52 : vector<16x512xf32> to vector<16x512xbf16>
    %c128 = arith.constant 128 : index
    %c0_12 = arith.constant 0 : index
    %54 = vector.load %arg7[%c128, %c0_12] : memref<144x512xbf16, #tpu.memory_space<vmem>>, vector<16x512xbf16>
    tpu.vector_store %arg7[%c128, %c0_12], %53 {strides = array<i32>} : memref<144x512xbf16, #tpu.memory_space<vmem>>, vector<16x512xbf16>,
    %c0_13 = arith.constant 0 : index
    %c0_14 = arith.constant 0 : index
    %55 = vector.load %arg3[%c0_13, %c0_14] : memref<8x144xbf16, #tpu.memory_space<vmem>>, vector<8x144xbf16>
    %c0_15 = arith.constant 0 : index
    %c0_16 = arith.constant 0 : index
    %56 = vector.load %arg7[%c0_15, %c0_16] : memref<144x512xbf16, #tpu.memory_space<vmem>>, vector<144x512xbf16>
    %cst = arith.constant dense<0.000000e+00> : vector<8x512xf32>
    %57 = tpu.matmul %55, %56, %cst {dimension_numbers = #tpu.dot_dimension_numbers<[1], [0], [0], [1], [0, 0, 1, 1], [], []>} : vector<8x144xbf16>, vector<144x512xbf16>, vector<8x512xf32> -> vector<8x512xf32>
    %cst_17 = arith.constant dense<0.000000e+00> : vector<8xf32>
    %58 = vector.multi_reduction <add>, %57, %cst_17 [1] : vector<8x512xf32> to vector<8xf32>
    %59 = vector.shape_cast %58 : vector<8xf32> to vector<8x1xf32>
    %cst_18 = arith.constant 0.001953125 : f32
    %60 = vector.broadcast %cst_18 : f32 to vector<8x1xf32>
    %61 = arith.mulf %59, %60 : vector<8x1xf32>
    %62 = arith.mulf %57, %57 : vector<8x512xf32>
    %cst_19 = arith.constant dense<0.000000e+00> : vector<8xf32>
    %63 = vector.multi_reduction <add>, %62, %cst_19 [1] : vector<8x512xf32> to vector<8xf32>
    %64 = vector.shape_cast %63 : vector<8xf32> to vector<8x1xf32>
    %cst_20 = arith.constant 0.001953125 : f32
    %65 = vector.broadcast %cst_20 : f32 to vector<8x1xf32>
    %66 = arith.mulf %64, %65 : vector<8x1xf32>
    %67 = arith.mulf %61, %61 : vector<8x1xf32>
    %68 = arith.subf %66, %67 : vector<8x1xf32>
    %cst_21 = arith.constant 0.000000e+00 : f32
    %69 = vector.broadcast %cst_21 : f32 to vector<8x1xf32>
    %70 = arith.maximumf %68, %69 : vector<8x1xf32>
    %c0_22 = arith.constant 0 : index
    %c0_23 = arith.constant 0 : index
    %71 = vector.load %arg4[%c0_22, %c0_23] : memref<8x1xf32, #tpu.memory_space<vmem>>, vector<8x1xf32>
    %cst_24 = arith.constant 9.99999974E-6 : f32
    %72 = vector.broadcast %cst_24 : f32 to vector<8x1xf32>
    %73 = arith.addf %70, %72 : vector<8x1xf32>
    %74 = math.rsqrt %73 : vector<8x1xf32>
    %75 = arith.mulf %71, %74 : vector<8x1xf32>
    %c0_25 = arith.constant 0 : index
    %c0_26 = arith.constant 0 : index
    %76 = vector.load %arg5[%c0_25, %c0_26] : memref<8x1xf32, #tpu.memory_space<vmem>>, vector<8x1xf32>
    %77 = arith.mulf %61, %75 : vector<8x1xf32>
    %78 = arith.subf %76, %77 : vector<8x1xf32>
    %79 = vector.broadcast %75 : vector<8x1xf32> to vector<8x512xf32>
    %80 = arith.mulf %57, %79 : vector<8x512xf32>
    %81 = vector.broadcast %78 : vector<8x1xf32> to vector<8x512xf32>
    %82 = arith.addf %80, %81 : vector<8x512xf32>
    %cst_27 = arith.constant 0.000000e+00 : f32
    %83 = vector.broadcast %cst_27 : f32 to vector<8x512xf32>
    %84 = arith.maximumf %82, %83 : vector<8x512xf32>
    %c0_28 = arith.constant 0 : index
    %c0_29 = arith.constant 0 : index
    %85 = vector.load %arg6[%c0_28, %c0_29] : memref<8x512xf32, #tpu.memory_space<vmem>>, vector<8x512xf32>
    tpu.vector_store %arg6[%c0_28, %c0_29], %84 {strides = array<i32>} : memref<8x512xf32, #tpu.memory_space<vmem>>, vector<8x512xf32>,
    return
  }
  func.func @transform_0(%arg0: i32) -> (i32, i32) {
    %c0_i32 = arith.constant 0 : i32
    %c0_i32_0 = arith.constant 0 : i32
    %c0_i32_1 = arith.constant 0 : i32
    return %c0_i32, %c0_i32_0 : i32, i32
  }
  func.func @transform_1(%arg0: i32) -> (i32, i32) {
    %c0_i32 = arith.constant 0 : i32
    %c0_i32_0 = arith.constant 0 : i32
    %c0_i32_1 = arith.constant 0 : i32
    return %c0_i32, %c0_i32_0 : i32, i32
  }
  func.func @transform_2(%arg0: i32) -> (i32, i32) {
    %c0_i32 = arith.constant 0 : i32
    %c0_i32_0 = arith.constant 0 : i32
    %c0_i32_1 = arith.constant 0 : i32
    return %c0_i32, %c0_i32_0 : i32, i32
  }
  func.func @transform_3(%arg0: i32) -> (i32, i32) {
    %c0_i32 = arith.constant 0 : i32
    %c0_i32_0 = arith.constant 0 : i32
    %c0_i32_1 = arith.constant 0 : i32
    return %c0_i32, %c0_i32_0 : i32, i32
  }
  func.func @transform_4(%arg0: i32) -> (i32, i32) {
    %c0_i32 = arith.constant 0 : i32
    %c0_i32_0 = arith.constant 0 : i32
    %c0_i32_1 = arith.constant 0 : i32
    return %c0_i32, %c0_i32_0 : i32, i32
  }
  func.func @transform_5(%arg0: i32) -> (i32, i32) {
    %c0_i32 = arith.constant 0 : i32
    %c0_i32_0 = arith.constant 0 : i32
    %c0_i32_1 = arith.constant 0 : i32
    return %c0_i32, %c0_i32_0 : i32, i32
  }
}

</mosaic_0001>

<bundles_post_ra>
// kernel: two_conv_block.3
= control target key start
LH: loop header
LB: loop body
LE: loop exit
PB: predicated region body
PF: predicated region fallthrough
CT: control target
= control target key end

     0   :  { %s1235_s22 = smov 112   ;;  %s1236_s6 = smov 113   ;;  %v53_v8 = vlaneseq  ;;  %vm930_vm0 = vcmask 130048   ;;  %s1649_s0 = inlined_call_operand.vmem [shape: f32[16,512], index: 0, kind: input, shape index: {}]   ;;  %s1650_s1 = inlined_call_operand.vmem [shape: f32[16,512], index: 1, kind: input, shape index: {}]   ;;  %s1651_s2 = inlined_call_operand.vmem [shape: bf16[8,144], index: 2, kind: input, shape index: {}]   ;;  %s1652_s3 = inlined_call_operand.vmem [shape: f32[8,1], index: 3, kind: input, shape index: {}]   ;;  %s1653_s4 = inlined_call_operand.vmem [shape: f32[8,1], index: 4, kind: input, shape index: {}]   ;;  %s1654_s5 = inlined_call_operand.vmem [shape: f32[8,512], index: 5, kind: output, shape index: {}]  }
   0x1   :  { %v1277_v0 = vld [vmem:[%s1649_s0 + $0x10] sm:$0xff]  ;;  %v1282_v1 = vld [vmem:[%s1649_s0 + $0x8] sm:$0xff]  ;;  %v1301_v4 = vld [vmem:[%s1649_s0 + $0x20] sm:$0xff]  ;;  %s1237_s11 = smov 127   ;;  %s1239_s12 = smov 15  }
   0x2   :  { %561 = vrot.lane.b32.xlu1 %v1277_v0, %s1235_s22  ;;  %557 = vrot.lane.b32.xlu0 %v1282_v1, %s1235_s22  ;;  %v1289_v2 = vld [vmem:[%s1649_s0 + $0x30] sm:$0xff]  ;;  %v1294_v3 = vld [vmem:[%s1649_s0 + $0x28] sm:$0xff]  ;;  %s1240_s13 = smov 16   ;;  %s1241_s14 = smov 17   ;;  %v1370_v9 = vshrl.u32 %v53_v8, 7  ;;  %v1372_v10 = vand.u32 127, %v53_v8 }
   0x3   :  { %v1306_v5 = vld [vmem:[%s1649_s0] sm:$0xff]  ;;  %v1317_v6 = vld [vmem:[%s1649_s0 + $0x38] sm:$0xff]  ;;  %s1242_s15 = smov 111   ;;  %v1387_v13 = vld [vmem:[%s1650_s1 + $0x8] sm:$0xff] }
   0x4   :  { %v1322_v7 = vld [vmem:[%s1649_s0 + $0x18] sm:$0xff]  ;;  %s1238_s0 = smov 1   ;;  %v580_v11 = vsub.s32 7, %v1370_v9  ;;  %v1382_v12 = vld [vmem:[%s1651_s2] sm:$0xff]  ;;  %vm569_vm1 = vcmp.lt.s32.totalorder %v1372_v10, 112  ;;  %v503_v33 = vsub.s32 6, %v1370_v9 }
   0x5   :  { %v1109_v14 = vcombine.high %v1382_v12, %v1382_v12  ;;  %v1402_v19 = vld [vmem:[%s1650_s1] sm:$0xff]  ;;  %vm492_vm2 = vcmp.lt.s32.totalorder %v1372_v10, 113  ;;  %v1425_v38 = vld [vmem:[%s1650_s1 + $0x10] sm:$0xff]  ;;  %v1430_v39 = vld [vmem:[%s1650_s1 + $0x18] sm:$0xff]  ;;  %vm415_vm3 = vcmp.lt.s32.totalorder %v1372_v10, 127  ;;  %vm286_vm4 = vcmp.lt.s32.totalorder %v1372_v10, 1 }
   0x6   :  { %563 = vrot.lane.b32.xlu1 %v1289_v2, %s1235_s22  ;;  %559 = vrot.lane.b32.xlu0 %v1294_v3, %s1235_s22  ;;  %v585_v17 = vrot.slane %v1387_v13, %v580_v11  ;;  %v581_v23 = vrot.slane %v1402_v19, %v580_v11  ;;  %v508_v37 = vrot.slane %v1387_v13, %v503_v33  ;;  %vm209_vm5 = vcmp.lt.s32.totalorder %v1372_v10, 15 }
   0x7   :  { %1146 = vmatprep.mubr.msk.bf16.mxu0 %vm930_vm0, %v1109_v14  ;;  %1147 = vmatprep.mubr.msk.bf16.mxu1 %vm930_vm0, %v1109_v14  ;;  %v589_v46 = vrot.slane %v1425_v38, %v580_v11  ;;  %v593_v47 = vrot.slane %v1430_v39, %v580_v11  ;;  %v504_v51 = vrot.slane %v1402_v19, %v503_v33  ;;  %vm132_vm6 = vcmp.lt.s32.totalorder %v1372_v10, 16 }
   0x8   :  { %vm55_vm7 = vcmp.lt.s32.totalorder %v1372_v10, 17  ;;  %vm646_vm8 = vcmp.lt.s32.totalorder %v1372_v10, 111 }
   0xa   :  { %555 = vrot.lane.b32.xlu1 %v1301_v4, %s1235_s22  ;;  %553 = vrot.lane.b32.xlu0 %v1306_v5, %s1235_s22 }
   0xe   :  { %482 = vrot.lane.b32.xlu1 %v1294_v3, %s1236_s6  ;;  %480 = vrot.lane.b32.xlu0 %v1282_v1, %s1236_s6 }
  0x12   :  { %486 = vrot.lane.b32.xlu1 %v1289_v2, %s1236_s6  ;;  %484 = vrot.lane.b32.xlu0 %v1277_v0, %s1236_s6 }
  0x16   :  { %567 = vrot.lane.b32.xlu1 %v1317_v6, %s1235_s22  ;;  %565 = vrot.lane.b32.xlu0 %v1322_v7, %s1235_s22 }
  0x1a   :  { %478 = vrot.lane.b32.xlu1 %v1301_v4, %s1236_s6  ;;  %476 = vrot.lane.b32.xlu0 %v1306_v5, %s1236_s6 }
  0x1e   :  { %405 = vrot.lane.b32.xlu1 %v1294_v3, %s1237_s11  ;;  %403 = vrot.lane.b32.xlu0 %v1282_v1, %s1237_s11 }
  0x22   :  { %409 = vrot.lane.b32.xlu1 %v1289_v2, %s1237_s11  ;;  %407 = vrot.lane.b32.xlu0 %v1277_v0, %s1237_s11 }
  0x26   :  { %490 = vrot.lane.b32.xlu1 %v1317_v6, %s1236_s6  ;;  %488 = vrot.lane.b32.xlu0 %v1322_v7, %s1236_s6 }
  0x2a   :  { %401 = vrot.lane.b32.xlu1 %v1301_v4, %s1237_s11  ;;  %399 = vrot.lane.b32.xlu0 %v1306_v5, %s1237_s11 }
  0x2e   :  { %413 = vrot.lane.b32.xlu1 %v1317_v6, %s1237_s11  ;;  %411 = vrot.lane.b32.xlu0 %v1322_v7, %s1237_s11 }
  0x32   :  { %272 = vrot.lane.b32.xlu1 %v1301_v4, %s1238_s0  ;;  %270 = vrot.lane.b32.xlu0 %v1306_v5, %s1238_s0 }
  0x36   :  { %276 = vrot.lane.b32.xlu1 %v1294_v3, %s1238_s0  ;;  %274 = vrot.lane.b32.xlu0 %v1282_v1, %s1238_s0 }
  0x3a   :  { %284 = vrot.lane.b32.xlu1 %v1317_v6, %s1238_s0  ;;  %282 = vrot.lane.b32.xlu0 %v1322_v7, %s1238_s0 }
  0x3e   :  { %195 = vrot.lane.b32.xlu1 %v1301_v4, %s1239_s12  ;;  %193 = vrot.lane.b32.xlu0 %v1306_v5, %s1239_s12 }
  0x42   :  { %199 = vrot.lane.b32.xlu1 %v1294_v3, %s1239_s12  ;;  %197 = vrot.lane.b32.xlu0 %v1282_v1, %s1239_s12 }
  0x46   :  { %280 = vrot.lane.b32.xlu1 %v1289_v2, %s1238_s0  ;;  %278 = vrot.lane.b32.xlu0 %v1277_v0, %s1238_s0 }
  0x4a   :  { %207 = vrot.lane.b32.xlu1 %v1317_v6, %s1239_s12  ;;  %205 = vrot.lane.b32.xlu0 %v1322_v7, %s1239_s12 }
  0x4e   :  { %118 = vrot.lane.b32.xlu1 %v1301_v4, %s1240_s13  ;;  %116 = vrot.lane.b32.xlu0 %v1306_v5, %s1240_s13 }
  0x52   :  { %122 = vrot.lane.b32.xlu1 %v1294_v3, %s1240_s13  ;;  %120 = vrot.lane.b32.xlu0 %v1282_v1, %s1240_s13 }
  0x56   :  { %203 = vrot.lane.b32.xlu1 %v1289_v2, %s1239_s12  ;;  %201 = vrot.lane.b32.xlu0 %v1277_v0, %s1239_s12 }
  0x5a   :  { %130 = vrot.lane.b32.xlu1 %v1317_v6, %s1240_s13  ;;  %128 = vrot.lane.b32.xlu0 %v1322_v7, %s1240_s13 }
  0x5e   :  { %39 = vrot.lane.b32.xlu1 %v1301_v4, %s1241_s14  ;;  %37 = vrot.lane.b32.xlu0 %v1306_v5, %s1241_s14 }
  0x62   :  { %43 = vrot.lane.b32.xlu1 %v1294_v3, %s1241_s14  ;;  %41 = vrot.lane.b32.xlu0 %v1282_v1, %s1241_s14 }
  0x66   :  { %126 = vrot.lane.b32.xlu1 %v1289_v2, %s1240_s13  ;;  %124 = vrot.lane.b32.xlu0 %v1277_v0, %s1240_s13 }
  0x6a   :  { %51 = vrot.lane.b32.xlu1 %v1317_v6, %s1241_s14  ;;  %49 = vrot.lane.b32.xlu0 %v1322_v7, %s1241_s14 }
  0x6e   :  { %47 = vrot.lane.b32.xlu1 %v1289_v2, %s1241_s14  ;;  %45 = vrot.lane.b32.xlu0 %v1277_v0, %s1241_s14 }
  0x72   :  { %636 = vrot.lane.b32.xlu1 %v1294_v3, %s1242_s15  ;;  %634 = vrot.lane.b32.xlu0 %v1282_v1, %s1242_s15 }
  0x74   :  { %v562_v15 = vpop.permute.xlu1 %561  ;;  %v558_v16 = vpop.permute.xlu0 %557 }
  0x75   :  { %v572_v18 = vsel %vm569_vm1, %v558_v16, %v562_v15 }
  0x76   :  { %640 = vrot.lane.b32.xlu1 %v1289_v2, %s1242_s15  ;;  %638 = vrot.lane.b32.xlu0 %v1277_v0, %s1242_s15  ;;  %v595_v24 = vmul.f32 %v585_v17, %v572_v18 }
  0x78   :  { %v564_v20 = vpop.permute.xlu1 %563  ;;  %v560_v21 = vpop.permute.xlu0 %559 }
  0x79   :  { %v573_v22 = vsel %vm569_vm1, %v560_v21, %v564_v20 }
  0x7a   :  { %632 = vrot.lane.b32.xlu1 %v1301_v4, %s1242_s15  ;;  %630 = vrot.lane.b32.xlu0 %v1306_v5, %s1242_s15  ;;  %v599_v25 = vmul.f32 %v585_v17, %v573_v22  ;;  %v349_v22 = vsub.s32 4, %v1370_v9 }
  0x7c   :  { %v556_v26 = vpop.permute.xlu1 %555  ;;  %v554_v27 = vpop.permute.xlu0 %553  ;;  %v1213_v28 = vpack.c.bf16 %v599_v25, %v595_v24 }
  0x7d   :  { %v575_v29 = vsel %vm569_vm1, %v556_v26, %v560_v21  ;;  %v574_v30 = vsel %vm569_vm1, %v554_v27, %v558_v16  ;;  %v426_v16 = vsub.s32 5, %v1370_v9 }
  0x7e   :  { %v598_v31 = vmul.f32 %v581_v23, %v575_v29  ;;  %v594_v32 = vmul.f32 %v581_v23, %v574_v30  ;;  %644 = vrot.lane.b32.xlu1 %v1317_v6, %s1242_s15  ;;  %934 = vmatprep.subr.bf16.mxu0 %v1213_v28  ;;  %v512_v29 = vrot.slane %v1425_v38, %v503_v33 }
  0x7f   :  { %642 = vrot.lane.b32.xlu0 %v1322_v7, %s1242_s15  ;;  %v431_v21 = vrot.slane %v1387_v13, %v426_v16  ;;  %v516_v30 = vrot.slane %v1430_v39, %v503_v33 }
  0x80   :  { %v483_v34 = vpop.permute.xlu1 %482  ;;  %v481_v35 = vpop.permute.xlu0 %480  ;;  %v1212_v36 = vpack.c.bf16 %v598_v31, %v594_v32  ;;  %v354_v31 = vrot.slane %v1387_v13, %v349_v22  ;;  %v350_v32 = vrot.slane %v1402_v19, %v349_v22 }
  0x82   :  { %935 = vmatpush1.bf16.msra.mxu0 %v1212_v36 }
  0x84   :  { %v487_v40 = vpop.permute.xlu1 %486  ;;  %v485_v41 = vpop.permute.xlu0 %484 }
  0x85   :  { %v496_v42 = vsel %vm492_vm2, %v483_v34, %v487_v40  ;;  %v495_v43 = vsel %vm492_vm2, %v481_v35, %v485_v41 }
  0x86   :  { %v522_v44 = vmul.f32 %v508_v37, %v496_v42  ;;  %v518_v45 = vmul.f32 %v508_v37, %v495_v43  ;;  %v427_v37 = vrot.slane %v1402_v19, %v426_v16 }
  0x88   :  { %v568_v48 = vpop.permute.xlu1 %567  ;;  %v566_v49 = vpop.permute.xlu0 %565  ;;  %v1209_v50 = vpack.c.bf16 %v522_v44, %v518_v45 }
  0x89   :  { %v571_v52 = vsel %vm569_vm1, %v564_v20, %v568_v48  ;;  %v577_v53 = vsel %vm569_vm1, %v568_v48, %v556_v26  ;;  %v570_v54 = vsel %vm569_vm1, %v562_v15, %v566_v49  ;;  %v576_v55 = vsel %vm569_vm1, %v566_v49, %v554_v27 }
  0x8a   :  { %v600_v56 = vmul.f32 %v589_v46, %v571_v52  ;;  %v596_v57 = vmul.f32 %v589_v46, %v570_v54  ;;  %936 = vmatprep.subr.bf16.mxu0 %v1209_v50  ;;  %v597_v58 = vmul.f32 %v593_v47, %v576_v55  ;;  %v601_v59 = vmul.f32 %v593_v47, %v577_v53 }
  0x8b   :  { %v364_v49 = vmul.f32 %v354_v31, %v1282_v1  ;;  %v368_v50 = vmul.f32 %v354_v31, %v1294_v3  ;;  %v362_v55 = vrot.slane %v1430_v39, %v349_v22  ;;  %v435_v3 = vrot.slane %v1425_v38, %v426_v16 }
  0x8c   :  { %v479_v60 = vpop.permute.xlu1 %478  ;;  %v477_v61 = vpop.permute.xlu0 %476  ;;  %v1215_v62 = vpack.c.bf16 %v601_v59, %v597_v58  ;;  %v1214_v63 = vpack.c.bf16 %v600_v56, %v596_v57  ;;  %v1484_v59 = vsub.s32 3, %v1370_v9 }
  0x8d   :  { %v498_v8 = vsel %vm492_vm2, %v479_v60, %v483_v34  ;;  %v497_v11 = vsel %vm492_vm2, %v477_v61, %v481_v35 }
  0x8e   :  { %v521_v14 = vmul.f32 %v504_v51, %v498_v8  ;;  %v517_v15 = vmul.f32 %v504_v51, %v497_v11  ;;  %975 = vmatprep.subr.bf16.mxu1 %v1215_v62  ;;  %v366_v11 = vmul.f32 %v362_v55, %v1322_v7 }
  0x8f   :  { %976 = vmatpush1.bf16.msra.mxu1 %v1214_v63 }
  0x90   :  { %v406_v17 = vpop.permute.xlu1 %405  ;;  %v404_v18 = vpop.permute.xlu0 %403  ;;  %v1208_v20 = vpack.c.bf16 %v521_v14, %v517_v15  ;;  %v370_v14 = vmul.f32 %v362_v55, %v1317_v6 }
  0x92   :  { %937 = vmatpush1.bf16.msra.mxu0 %v1208_v20 }
  0x94   :  { %v410_v23 = vpop.permute.xlu1 %409  ;;  %v408_v24 = vpop.permute.xlu0 %407 }
  0x95   :  { %v419_v25 = vsel %vm415_vm3, %v406_v17, %v410_v23  ;;  %v418_v26 = vsel %vm415_vm3, %v404_v18, %v408_v24 }
  0x96   :  { %v445_v27 = vmul.f32 %v431_v21, %v419_v25  ;;  %v441_v28 = vmul.f32 %v431_v21, %v418_v26 }
  0x98   :  { %v491_v34 = vpop.permute.xlu1 %490  ;;  %v489_v35 = vpop.permute.xlu0 %488  ;;  %v1205_v36 = vpack.c.bf16 %v445_v27, %v441_v28 }
  0x99   :  { %v494_v42 = vsel %vm492_vm2, %v487_v40, %v491_v34  ;;  %v500_v43 = vsel %vm492_vm2, %v491_v34, %v479_v60  ;;  %v493_v44 = vsel %vm492_vm2, %v485_v41, %v489_v35  ;;  %v499_v33 = vsel %vm492_vm2, %v489_v35, %v477_v61 }
  0x9a   :  { %v523_v45 = vmul.f32 %v512_v29, %v494_v42  ;;  %v524_v46 = vmul.f32 %v516_v30, %v500_v43  ;;  %v519_v47 = vmul.f32 %v512_v29, %v493_v44  ;;  %v520_v48 = vmul.f32 %v516_v30, %v499_v33  ;;  %938 = vmatprep.subr.bf16.mxu0 %v1205_v36 }
  0x9b   :  { %v363_v40 = vmul.f32 %v350_v32, %v1306_v5  ;;  %v367_v41 = vmul.f32 %v350_v32, %v1301_v4  ;;  %v439_v5 = vrot.slane %v1430_v39, %v426_v16  ;;  %v1201_v4 = vpack.c.bf16 %v368_v50, %v364_v49 }
  0x9c   :  { %v402_v51 = vpop.permute.xlu1 %401  ;;  %v400_v52 = vpop.permute.xlu0 %399  ;;  %v1211_v53 = vpack.c.bf16 %v524_v46, %v520_v48  ;;  %v1210_v54 = vpack.c.bf16 %v523_v45, %v519_v47  ;;  %v358_v60 = vrot.slane %v1425_v38, %v349_v22  ;;  %v1203_v29 = vpack.c.bf16 %v370_v14, %v366_v11 }
  0x9d   :  { %v421_v56 = vsel %vm415_vm3, %v402_v51, %v406_v17  ;;  %v420_v57 = vsel %vm415_vm3, %v400_v52, %v404_v18  ;;  %v1200_v8 = vpack.c.bf16 %v367_v41, %v363_v40  ;;  %v298_v36 = vrot.slane %v1402_v19, %v1484_v59 }
  0x9e   :  { %v444_v58 = vmul.f32 %v427_v37, %v421_v56  ;;  %v440_v1 = vmul.f32 %v427_v37, %v420_v57  ;;  %977 = vmatprep.subr.bf16.mxu1 %v1211_v53  ;;  %v365_v6 = vmul.f32 %v358_v60, %v1277_v0  ;;  %v369_v7 = vmul.f32 %v358_v60, %v1289_v2 }
  0x9f   :  { %978 = vmatpush1.bf16.msra.mxu1 %v1210_v54  ;;  %v220_v47 = vsub.s32 2, %v1370_v9  ;;  %v306_v56 = vrot.slane %v1425_v38, %v1484_v59  ;;  %v310_v57 = vrot.slane %v1430_v39, %v1484_v59 }
  0xa0   :  { %v414_v61 = vpop.permute.xlu1 %413  ;;  %v412_v62 = vpop.permute.xlu0 %411  ;;  %v1204_v63 = vpack.c.bf16 %v444_v58, %v440_v1  ;;  %v1202_v30 = vpack.c.bf16 %v369_v7, %v365_v6 }
  0xa1   :  { %v417_v15 = vsel %vm415_vm3, %v410_v23, %v414_v61  ;;  %v423_v16 = vsel %vm415_vm3, %v414_v61, %v402_v51  ;;  %v416_v17 = vsel %vm415_vm3, %v408_v24, %v412_v62  ;;  %v422_v18 = vsel %vm415_vm3, %v412_v62, %v400_v52 }
  0xa2   :  { %v446_v20 = vmul.f32 %v435_v3, %v417_v15  ;;  %v447_v21 = vmul.f32 %v439_v5, %v423_v16  ;;  %v442_v22 = vmul.f32 %v435_v3, %v416_v17  ;;  %v443_v25 = vmul.f32 %v439_v5, %v422_v18  ;;  %939 = vmatpush1.bf16.msra.mxu0 %v1204_v63 }
  0xa3   :  { %940 = vmatprep.subr.bf16.mxu0 %v1201_v4  ;;  %v302_v24 = vrot.slane %v1387_v13, %v1484_v59  ;;  %v225_v40 = vrot.slane %v1387_v13, %v220_v47  ;;  %v221_v5 = vrot.slane %v1402_v19, %v220_v47 }
  0xa4   :  { %v273_v23 = vpop.permute.xlu1 %272  ;;  %v271_v26 = vpop.permute.xlu0 %270  ;;  %v1207_v27 = vpack.c.bf16 %v447_v21, %v443_v25  ;;  %v1206_v28 = vpack.c.bf16 %v446_v20, %v442_v22  ;;  %v143_v25 = vsub.s32 1, %v1370_v9 }
  0xa6   :  { %979 = vmatprep.subr.bf16.mxu1 %v1207_v27  ;;  %941 = vmatpush1.bf16.msra.mxu0 %v1200_v8 }
  0xa7   :  { %980 = vmatpush1.bf16.msra.mxu1 %v1206_v28 }
  0xa8   :  { %v277_v31 = vpop.permute.xlu1 %276  ;;  %v275_v32 = vpop.permute.xlu0 %274  ;;  %981 = vmatprep.subr.bf16.mxu1 %v1203_v29 }
  0xa9   :  { %v292_v0 = vsel %vm286_vm4, %v273_v23, %v277_v31  ;;  %v291_v2 = vsel %vm286_vm4, %v271_v26, %v275_v32 }
  0xaa   :  { %v316_v34 = vmul.f32 %v302_v24, %v292_v0  ;;  %v312_v35 = vmul.f32 %v302_v24, %v291_v2  ;;  %v233_v0 = vrot.slane %v1430_v39, %v220_v47 }
  0xab   :  { %982 = vmatpush1.bf16.msra.mxu1 %v1202_v30 }
  0xac   :  { %v285_v37 = vpop.permute.xlu1 %284  ;;  %v283_v42 = vpop.permute.xlu0 %282  ;;  %v1197_v43 = vpack.c.bf16 %v316_v34, %v312_v35 }
  0xad   :  { %v294_v44 = vsel %vm286_vm4, %v285_v37, %v273_v23  ;;  %v293_v33 = vsel %vm286_vm4, %v283_v42, %v271_v26  ;;  %v148_v26 = vrot.slane %v1387_v13, %v143_v25 }
  0xae   :  { %v315_v45 = vmul.f32 %v298_v36, %v294_v44  ;;  %v311_v46 = vmul.f32 %v298_v36, %v293_v33  ;;  %942 = vmatprep.subr.bf16.mxu0 %v1197_v43  ;;  %v144_v36 = vrot.slane %v1402_v19, %v143_v25 }
  0xb0   :  { %v196_v48 = vpop.permute.xlu1 %195  ;;  %v194_v49 = vpop.permute.xlu0 %193  ;;  %v1196_v50 = vpack.c.bf16 %v315_v45, %v311_v46 }
  0xb2   :  { %943 = vmatpush1.bf16.msra.mxu0 %v1196_v50 }
  0xb4   :  { %v200_v51 = vpop.permute.xlu1 %199  ;;  %v198_v52 = vpop.permute.xlu0 %197 }
  0xb5   :  { %v215_v53 = vsel %vm209_vm5, %v196_v48, %v200_v51  ;;  %v214_v54 = vsel %vm209_vm5, %v194_v49, %v198_v52 }
  0xb6   :  { %v239_v41 = vmul.f32 %v225_v40, %v215_v53  ;;  %v235_v55 = vmul.f32 %v225_v40, %v214_v54 }
  0xb8   :  { %v281_v58 = vpop.permute.xlu1 %280  ;;  %v279_v1 = vpop.permute.xlu0 %278  ;;  %v1193_v3 = vpack.c.bf16 %v239_v41, %v235_v55 }
  0xb9   :  { %v288_v4 = vsel %vm286_vm4, %v281_v58, %v285_v37  ;;  %v290_v60 = vsel %vm286_vm4, %v277_v31, %v281_v58  ;;  %v287_v61 = vsel %vm286_vm4, %v279_v1, %v283_v42  ;;  %v289_v62 = vsel %vm286_vm4, %v275_v32, %v279_v1 }
  0xba   :  { %v317_v63 = vmul.f32 %v306_v56, %v290_v60  ;;  %v318_v8 = vmul.f32 %v310_v57, %v288_v4  ;;  %v313_v59 = vmul.f32 %v306_v56, %v289_v62  ;;  %v314_v11 = vmul.f32 %v310_v57, %v287_v61  ;;  %944 = vmatprep.subr.bf16.mxu0 %v1193_v3 }
  0xbb   :  { %v229_v32 = vrot.slane %v1425_v38, %v220_v47  ;;  %v152_v61 = vrot.slane %v1425_v38, %v143_v25  ;;  %v156_v62 = vrot.slane %v1430_v39, %v143_v25 }
  0xbc   :  { %v208_v14 = vpop.permute.xlu1 %207  ;;  %v206_v15 = vpop.permute.xlu0 %205  ;;  %v1199_v16 = vpack.c.bf16 %v318_v8, %v314_v11  ;;  %v1198_v17 = vpack.c.bf16 %v317_v63, %v313_v59 }
  0xbd   :  { %v217_v18 = vsel %vm209_vm5, %v208_v14, %v196_v48  ;;  %v216_v20 = vsel %vm209_vm5, %v206_v15, %v194_v49 }
  0xbe   :  { %v238_v21 = vmul.f32 %v221_v5, %v217_v18  ;;  %v234_v22 = vmul.f32 %v221_v5, %v216_v20  ;;  %983 = vmatprep.subr.bf16.mxu1 %v1199_v16 }
  0xbf   :  { %984 = vmatpush1.bf16.msra.mxu1 %v1198_v17 }
  0xc0   :  { %v119_v6 = vpop.permute.xlu1 %118  ;;  %v117_v7 = vpop.permute.xlu0 %116  ;;  %v1192_v23 = vpack.c.bf16 %v238_v21, %v234_v22 }
  0xc2   :  { %945 = vmatpush1.bf16.msra.mxu0 %v1192_v23 }
  0xc4   :  { %v123_v27 = vpop.permute.xlu1 %122  ;;  %v121_v28 = vpop.permute.xlu0 %120 }
  0xc5   :  { %v138_v29 = vsel %vm132_vm6, %v119_v6, %v123_v27  ;;  %v137_v24 = vsel %vm132_vm6, %v117_v7, %v121_v28 }
  0xc6   :  { %v162_v30 = vmul.f32 %v148_v26, %v138_v29  ;;  %v158_v31 = vmul.f32 %v148_v26, %v137_v24 }
  0xc8   :  { %v204_v2 = vpop.permute.xlu1 %203  ;;  %v202_v34 = vpop.permute.xlu0 %201  ;;  %v1189_v35 = vpack.c.bf16 %v162_v30, %v158_v31 }
  0xc9   :  { %v211_v37 = vsel %vm209_vm5, %v204_v2, %v208_v14  ;;  %v213_v42 = vsel %vm209_vm5, %v200_v51, %v204_v2  ;;  %v210_v43 = vsel %vm209_vm5, %v202_v34, %v206_v15  ;;  %v212_v44 = vsel %vm209_vm5, %v198_v52, %v202_v34 }
  0xca   :  { %v240_v33 = vmul.f32 %v229_v32, %v213_v42  ;;  %v241_v45 = vmul.f32 %v233_v0, %v211_v37  ;;  %v236_v46 = vmul.f32 %v229_v32, %v212_v44  ;;  %v237_v47 = vmul.f32 %v233_v0, %v210_v43  ;;  %946 = vmatprep.subr.bf16.mxu0 %v1189_v35  ;;  %v34_v37 = vld [vmem:[%s1650_s1 + $0x28] sm:$0xff] }
  0xcb   :  { %v1559_v52 = vsub.s32 0, %v1370_v9 }
  0xcc   :  { %v131_v48 = vpop.permute.xlu1 %130  ;;  %v129_v49 = vpop.permute.xlu0 %128  ;;  %v1195_v50 = vpack.c.bf16 %v241_v45, %v237_v47  ;;  %v1194_v40 = vpack.c.bf16 %v240_v33, %v236_v46  ;;  %v33_v46 = vld [vmem:[%s1650_s1 + $0x20] sm:$0xff] }
  0xcd   :  { %v140_v53 = vsel %vm132_vm6, %v131_v48, %v119_v6  ;;  %v139_v51 = vsel %vm132_vm6, %v129_v49, %v117_v7  ;;  %v71_v58 = vrot.slane %v1387_v13, %v1559_v52  ;;  %v67_v13 = vrot.slane %v1402_v19, %v1559_v52 }
  0xce   :  { %v161_v54 = vmul.f32 %v144_v36, %v140_v53  ;;  %v157_v41 = vmul.f32 %v144_v36, %v139_v51  ;;  %985 = vmatprep.subr.bf16.mxu1 %v1195_v50  ;;  %v79_v29 = vrot.slane %v1430_v39, %v1559_v52  ;;  %v662_v45 = vrot.slane %v34_v37, %v1559_v52 }
  0xcf   :  { %986 = vmatpush1.bf16.msra.mxu1 %v1194_v40  ;;  %v658_v51 = vrot.slane %v33_v46, %v1559_v52 }
  0xd0   :  { %v40_v55 = vpop.permute.xlu1 %39  ;;  %v38_v56 = vpop.permute.xlu0 %37  ;;  %v1188_v57 = vpack.c.bf16 %v161_v54, %v157_v41  ;;  %v35_v54 = vld [vmem:[%s1650_s1 + $0x30] sm:$0xff]  ;;  %v36_v41 = vld [vmem:[%s1650_s1 + $0x38] sm:$0xff] }
  0xd2   :  { %947 = vmatpush1.bf16.msra.mxu0 %v1188_v57 }
  0xd4   :  { %v44_v1 = vpop.permute.xlu1 %43  ;;  %v42_v3 = vpop.permute.xlu0 %41 }
  0xd5   :  { %v61_v5 = vsel %vm55_vm7, %v40_v55, %v44_v1  ;;  %v60_v4 = vsel %vm55_vm7, %v38_v56, %v42_v3 }
  0xd6   :  { %v85_v9 = vmul.f32 %v71_v58, %v61_v5  ;;  %v81_v60 = vmul.f32 %v71_v58, %v60_v4  ;;  %v666_v4 = vrot.slane %v35_v54, %v1559_v52 }
  0xd8   :  { %v127_v63 = vpop.permute.xlu1 %126  ;;  %v125_v8 = vpop.permute.xlu0 %124  ;;  %v1185_v59 = vpack.c.bf16 %v85_v9, %v81_v60  ;;  %v670_v9 = vrot.slane %v36_v41, %v1559_v52 }
  0xd9   :  { %v134_v11 = vsel %vm132_vm6, %v127_v63, %v131_v48  ;;  %v136_v14 = vsel %vm132_vm6, %v123_v27, %v127_v63  ;;  %v133_v15 = vsel %vm132_vm6, %v125_v8, %v129_v49  ;;  %v135_v16 = vsel %vm132_vm6, %v121_v28, %v125_v8 }
  0xda   :  { %v163_v17 = vmul.f32 %v152_v61, %v136_v14  ;;  %v164_v18 = vmul.f32 %v156_v62, %v134_v11  ;;  %v159_v20 = vmul.f32 %v152_v61, %v135_v16  ;;  %v160_v21 = vmul.f32 %v156_v62, %v133_v15  ;;  %948 = vmatprep.subr.bf16.mxu0 %v1185_v59 }
  0xdb   :  { %v75_v28 = vrot.slane %v1425_v38, %v1559_v52  ;;  %v1108_v59 = vcombine.low %v1382_v12, %v1382_v12 }
  0xdc   :  { %v52_v22 = vpop.permute.xlu1 %51  ;;  %v50_v25 = vpop.permute.xlu0 %49  ;;  %v1191_v19 = vpack.c.bf16 %v164_v18, %v160_v21  ;;  %v1190_v6 = vpack.c.bf16 %v163_v17, %v159_v20 }
  0xdd   :  { %v63_v7 = vsel %vm55_vm7, %v52_v22, %v40_v55  ;;  %v62_v23 = vsel %vm55_vm7, %v50_v25, %v38_v56 }
  0xde   :  { %v84_v26 = vmul.f32 %v67_v13, %v63_v7  ;;  %v80_v27 = vmul.f32 %v67_v13, %v62_v23  ;;  %987 = vmatprep.subr.bf16.mxu1 %v1191_v19 }
  0xdf   :  { %988 = vmatpush1.bf16.msra.mxu1 %v1190_v6 }
  0xe0   :  { %v48_v24 = vpop.permute.xlu1 %47  ;;  %v46_v30 = vpop.permute.xlu0 %45  ;;  %v1184_v31 = vpack.c.bf16 %v84_v26, %v80_v27 }
  0xe1   :  { %v57_v32 = vsel %vm55_vm7, %v48_v24, %v52_v22  ;;  %v59_v0 = vsel %vm55_vm7, %v44_v1, %v48_v24  ;;  %v56_v2 = vsel %vm55_vm7, %v46_v30, %v50_v25  ;;  %v58_v34 = vsel %vm55_vm7, %v42_v3, %v46_v30 }
  0xe2   :  { %v86_v38 = vmul.f32 %v75_v28, %v59_v0  ;;  %v87_v35 = vmul.f32 %v79_v29, %v57_v32  ;;  %v82_v36 = vmul.f32 %v75_v28, %v58_v34  ;;  %v83_v39 = vmul.f32 %v79_v29, %v56_v2  ;;  %949 = vmatpush1.bf16.msra.mxu0 %v1184_v31 }
  0xe3   :  { %v1243_v0 = vmov 0  }
  0xe4   :  { %v637_v42 = vpop.permute.xlu1 %636  ;;  %v635_v43 = vpop.permute.xlu0 %634  ;;  %v1187_v44 = vpack.c.bf16 %v87_v35, %v83_v39  ;;  %v1186_v33 = vpack.c.bf16 %v86_v38, %v82_v36  ;;  %1229 = vset.pattern.permute.xlu0 %v1243_v0  ;;  %1230 = vset.pattern.permute.xlu1 %v1243_v0 }
  0xe6   :  { %989 = vmatprep.subr.bf16.mxu1 %v1187_v44 }
  0xe7   :  { %990 = vmatpush1.bf16.msra.mxu1 %v1186_v33 }
  0xe8   :  { %v641_v47 = vpop.permute.xlu1 %640  ;;  %v639_v48 = vpop.permute.xlu0 %638 }
  0xe9   :  { %v650_v49 = vsel %vm646_vm8, %v637_v42, %v641_v47  ;;  %v649_v50 = vsel %vm646_vm8, %v635_v43, %v639_v48 }
  0xea   :  { %v676_v40 = vmul.f32 %v662_v45, %v650_v49  ;;  %v672_v53 = vmul.f32 %v662_v45, %v649_v50  ;;  %v1039_v45 = vld [vmem:[%s1653_s4] sm:$0xff] }
  0xec   :  { %v633_v55 = vpop.permute.xlu1 %632  ;;  %v631_v56 = vpop.permute.xlu0 %630  ;;  %v1217_v57 = vpack.c.bf16 %v676_v40, %v672_v53 }
  0xed   :  { %v652_v58 = vsel %vm646_vm8, %v633_v55, %v637_v42  ;;  %v651_v1 = vsel %vm646_vm8, %v631_v56, %v635_v43  ;;  %v1035_v43 = vld [vmem:[%s1652_s3] sm:$0xff] }
  0xee   :  { %v675_v3 = vmul.f32 %v658_v51, %v652_v58  ;;  %v671_v5 = vmul.f32 %v658_v51, %v651_v1  ;;  %964 = vmatprep.subr.bf16.mxu0 %v1217_v57 }
  0xf0   :  { %v645_v60 = vpop.permute.xlu1 %644  ;;  %v1216_v61 = vpack.c.bf16 %v675_v3, %v671_v5 }
  0xf1   :  { %v648_v62 = vsel %vm646_vm8, %v641_v47, %v645_v60  ;;  %v654_v63 = vsel %vm646_vm8, %v645_v60, %v633_v55  ;;  %v643_v8 = vpop.permute.xlu0 %642 }
  0xf2   :  { %v677_v13 = vmul.f32 %v666_v4, %v648_v62  ;;  %v678_v11 = vmul.f32 %v670_v9, %v654_v63  ;;  %v647_v14 = vsel %vm646_vm8, %v639_v48, %v643_v8  ;;  %v653_v52 = vsel %vm646_vm8, %v643_v8, %v631_v56  ;;  %965 = vmatpush2.bf16.msra.mxu0 %v1216_v61 }
  0xf3   :  { %v673_v15 = vmul.f32 %v666_v4, %v647_v14  ;;  %v674_v16 = vmul.f32 %v670_v9, %v653_v52 }
  0xf5   :  { %967 = vmatmul.mubr.bf16.vlgmr.msra.gmra.mxu0 %v1108_v59  ;;  %v1219_v17 = vpack.c.bf16 %v678_v11, %v674_v16  ;;  %v1218_v18 = vpack.c.bf16 %v677_v13, %v673_v15 }
  0xf7   :  { %1005 = vmatprep.subr.bf16.mxu1 %v1219_v17 }
  0xf8   :  { %1006 = vmatpush2.bf16.msra.mxu1 %v1218_v18 }
  0xfb   :  { %1008 = vmatmul.mubr.bf16.vlgmr.msra.gmra.mxu1 %v1108_v59 }
 0x1b5   :  { %v968_v20 = vpop.f32.mrf.mxu0 }
 0x1b6   :  { %v1022_v21 = vmul.f32 %v968_v20, %v968_v20 }
 0x1b7   :  { %v970_v12 = vpop.f32.mrf.mxu0 }
 0x1b8   :  { %v1016_v22 = vadd.f32 %v970_v12, %v968_v20  ;;  %v1023_v25 = vmul.f32 %v970_v12, %v970_v12 }
 0x1b9   :  { %v972_v19 = vpop.f32.mrf.mxu0 }
 0x1ba   :  { %v1026_v6 = vadd.f32 %v1023_v25, %v1022_v21 }
 0x1bb   :  { %v1009_v7 = vpop.f32.mrf.mxu1  ;;  %v973_v23 = vpop.f32.mrf.mxu0 }
 0x1bc   :  { %v1024_v10 = vmul.f32 %v1009_v7, %v1009_v7  ;;  %v1017_v26 = vadd.f32 %v1016_v22, %v1009_v7 }
 0x1bd   :  { %v1011_v27 = vpop.f32.mrf.mxu1 }
 0x1be   :  { %v1018_v28 = vadd.f32 %v1017_v26, %v1011_v27  ;;  %v1025_v29 = vmul.f32 %v1011_v27, %v1011_v27  ;;  %v1027_v24 = vadd.f32 %v1026_v6, %v1024_v10 }
 0x1bf   :  { %v1013_v30 = vpop.f32.mrf.mxu1 }
 0x1c0   :  { %1019 = vadd.xlane.f32.xlu0 %v1018_v28  ;;  %v1028_v31 = vadd.f32 %v1027_v24, %v1025_v29 }
 0x1c1   :  { %v1014_v32 = vpop.f32.mrf.mxu1 }
 0x1c2   :  { %1029 = vadd.xlane.f32.xlu1 %v1028_v31 }
 0x249   :  { %v1020_v2 = vpop.xlane.xlu0 %1019 }
 0x24a   :  { %v1021_v34 = vmul.f32 0.001953125, %v1020_v2 }
 0x24b   :  { %v1030_v38 = vpop.xlane.xlu1 %1029 }
 0x24c   :  { %v1032_v35 = vmul.f32 %v1021_v34, %v1021_v34  ;;  %v1031_v36 = vmul.f32 0.001953125, %v1030_v38 }
 0x24e   :  { %v1033_v39 = vsub.f32 %v1031_v36, %v1032_v35 }
 0x250   :  { %v1034_v37 = vmax.f32 %v1033_v39, 0.0 }
 0x252   :  { %v1036_v42 = vadd.f32 1e-05, %v1034_v37 }
 0x254   :  { %1233 = vrsqrt.f32 %v1036_v42 }
 0x261   :  { %v1234_v44 = vpop.eup %1233 }
 0x262   :  { %v1038_v33 = vmul.f32 %v1234_v44, %v1035_v43 }
 0x264   :  { %1044 = vperm.xlu0 %1229, %v1038_v33   ;;  %v1040_v46 = vmul.f32 %v1038_v33, %v1021_v34 }
 0x266   :  { %v1041_v47 = vsub.f32 %v1039_v45, %v1040_v46 }
 0x268   :  { %1053 = vperm.xlu1 %1230, %v1041_v47  }
 0x2df   :  { %v1045_v48 = vpop.permute.xlu0 %1044 }
 0x2e0   :  { %v1047_v49 = vmul.f32 %v1045_v48, %v968_v20  ;;  %v1048_v50 = vmul.f32 %v1045_v48, %v970_v12  ;;  %v1049_v40 = vmul.f32 %v1045_v48, %v1009_v7  ;;  %v1050_v53 = vmul.f32 %v1045_v48, %v1011_v27 }
 0x2e3   :  { %v1054_v51 = vpop.permute.xlu1 %1053 }
 0x2e4   :  { %v1056_v54 = vadd.f32 %v1054_v51, %v1047_v49  ;;  %v1057_v41 = vadd.f32 %v1054_v51, %v1048_v50  ;;  %v1058_v55 = vadd.f32 %v1054_v51, %v1049_v40  ;;  %v1059_v56 = vadd.f32 %v1054_v51, %v1050_v53 }
 0x2e6   :  { %v1060_v57 = vmax.f32 %v1056_v54, 0.0  ;;  %v1061_v58 = vmax.f32 %v1057_v41, 0.0  ;;  %v1062_v1 = vmax.f32 %v1058_v55, 0.0  ;;  %v1063_v3 = vmax.f32 %v1059_v56, 0.0 }
 0x2e8   :  { %1064 = vst [vmem:[%s1654_s5] sm:$0xff] %v1060_v57  ;;  %1065 = vst [vmem:[%s1654_s5 + $0x8] sm:$0xff] %v1061_v58 }
 0x2e9   :  { %1066 = vst [vmem:[%s1654_s5 + $0x10] sm:$0xff] %v1062_v1  ;;  %1067 = vst [vmem:[%s1654_s5 + $0x18] sm:$0xff] %v1063_v3 }

// kernel: two_conv_block.2
= control target key start
LH: loop header
LB: loop body
LE: loop exit
PB: predicated region body
PF: predicated region fallthrough
CT: control target
= control target key end

     0   :  { %s1298_s22 = smov 112   ;;  %s1299_s6 = smov 113   ;;  %v53_v8 = vlaneseq  ;;  %vm934_vm1 = vcmask 130048   ;;  %s1763_s0 = inlined_call_operand.vmem [shape: f32[16,512], index: 0, kind: input, shape index: {}]   ;;  %s1764_s1 = inlined_call_operand.vmem [shape: f32[16,512], index: 1, kind: input, shape index: {}]   ;;  %s1765_s2 = inlined_call_operand.vmem [shape: bf16[16,144], index: 2, kind: input, shape index: {}]   ;;  %s1766_s3 = inlined_call_operand.vmem [shape: f32[16,1], index: 3, kind: input, shape index: {}]   ;;  %s1767_s4 = inlined_call_operand.vmem [shape: f32[16,1], index: 4, kind: input, shape index: {}]   ;;  %s1768_s5 = inlined_call_operand.vmem [shape: f32[16,512], index: 5, kind: output, shape index: {}]  }
   0x1   :  { %v1340_v0 = vld [vmem:[%s1763_s0 + $0x10] sm:$0xff]  ;;  %v1345_v1 = vld [vmem:[%s1763_s0 + $0x8] sm:$0xff]  ;;  %v1364_v4 = vld [vmem:[%s1763_s0 + $0x20] sm:$0xff]  ;;  %s1300_s11 = smov 127   ;;  %s1302_s12 = smov 15  }
   0x2   :  { %561 = vrot.lane.b32.xlu1 %v1340_v0, %s1298_s22  ;;  %557 = vrot.lane.b32.xlu0 %v1345_v1, %s1298_s22  ;;  %v1352_v2 = vld [vmem:[%s1763_s0 + $0x30] sm:$0xff]  ;;  %v1357_v3 = vld [vmem:[%s1763_s0 + $0x28] sm:$0xff]  ;;  %s1303_s13 = smov 16   ;;  %s1304_s14 = smov 17   ;;  %v1433_v9 = vshrl.u32 %v53_v8, 7  ;;  %v1435_v10 = vand.u32 127, %v53_v8 }
   0x3   :  { %v1369_v5 = vld [vmem:[%s1763_s0] sm:$0xff]  ;;  %v1380_v6 = vld [vmem:[%s1763_s0 + $0x38] sm:$0xff]  ;;  %s1305_s15 = smov 111   ;;  %v1445_v12 = vld [vmem:[%s1764_s1 + $0x8] sm:$0xff] }
   0x4   :  { %v1385_v7 = vld [vmem:[%s1763_s0 + $0x18] sm:$0xff]  ;;  %s1301_s0 = smov 1   ;;  %v580_v11 = vsub.s32 7, %v1433_v9  ;;  %vm569_vm0 = vcmp.lt.s32.totalorder %v1435_v10, 112  ;;  %v1293_v15 = vld [vmem:[%s1765_s2 + $0x4] ss:$8 sps:$4 sm:$0xff]  }
   0x5   :  { %v1461_v18 = vld [vmem:[%s1764_s1] sm:$0xff]  ;;  %1206 = vmatprep.mubr.msk.bf16.mxu0 %vm934_vm1, %v1293_v15  ;;  %1207 = vmatprep.mubr.msk.bf16.mxu1 %vm934_vm1, %v1293_v15  ;;  %v503_v32 = vsub.s32 6, %v1433_v9  ;;  %vm492_vm2 = vcmp.lt.s32.totalorder %v1435_v10, 113  ;;  %v1484_v37 = vld [vmem:[%s1764_s1 + $0x10] sm:$0xff]  ;;  %v1489_v38 = vld [vmem:[%s1764_s1 + $0x18] sm:$0xff]  ;;  %vm415_vm3 = vcmp.lt.s32.totalorder %v1435_v10, 127 }
   0x6   :  { %563 = vrot.lane.b32.xlu1 %v1352_v2, %s1298_s22  ;;  %559 = vrot.lane.b32.xlu0 %v1357_v3, %s1298_s22  ;;  %v585_v16 = vrot.slane %v1445_v12, %v580_v11  ;;  %v581_v22 = vrot.slane %v1461_v18, %v580_v11  ;;  %v589_v45 = vrot.slane %v1484_v37, %v580_v11  ;;  %vm286_vm4 = vcmp.lt.s32.totalorder %v1435_v10, 1 }
   0x7   :  { %v508_v36 = vrot.slane %v1445_v12, %v503_v32  ;;  %v593_v46 = vrot.slane %v1489_v38, %v580_v11  ;;  %v504_v50 = vrot.slane %v1461_v18, %v503_v32  ;;  %vm209_vm5 = vcmp.lt.s32.totalorder %v1435_v10, 15 }
   0x8   :  { %vm132_vm6 = vcmp.lt.s32.totalorder %v1435_v10, 16  ;;  %vm55_vm7 = vcmp.lt.s32.totalorder %v1435_v10, 17  ;;  %vm646_vm8 = vcmp.lt.s32.totalorder %v1435_v10, 111 }
   0xa   :  { %555 = vrot.lane.b32.xlu1 %v1364_v4, %s1298_s22  ;;  %553 = vrot.lane.b32.xlu0 %v1369_v5, %s1298_s22 }
   0xe   :  { %482 = vrot.lane.b32.xlu1 %v1357_v3, %s1299_s6  ;;  %480 = vrot.lane.b32.xlu0 %v1345_v1, %s1299_s6 }
  0x12   :  { %486 = vrot.lane.b32.xlu1 %v1352_v2, %s1299_s6  ;;  %484 = vrot.lane.b32.xlu0 %v1340_v0, %s1299_s6 }
  0x16   :  { %567 = vrot.lane.b32.xlu1 %v1380_v6, %s1298_s22  ;;  %565 = vrot.lane.b32.xlu0 %v1385_v7, %s1298_s22 }
  0x1a   :  { %478 = vrot.lane.b32.xlu1 %v1364_v4, %s1299_s6  ;;  %476 = vrot.lane.b32.xlu0 %v1369_v5, %s1299_s6 }
  0x1e   :  { %405 = vrot.lane.b32.xlu1 %v1357_v3, %s1300_s11  ;;  %403 = vrot.lane.b32.xlu0 %v1345_v1, %s1300_s11 }
  0x22   :  { %409 = vrot.lane.b32.xlu1 %v1352_v2, %s1300_s11  ;;  %407 = vrot.lane.b32.xlu0 %v1340_v0, %s1300_s11 }
  0x26   :  { %490 = vrot.lane.b32.xlu1 %v1380_v6, %s1299_s6  ;;  %488 = vrot.lane.b32.xlu0 %v1385_v7, %s1299_s6 }
  0x2a   :  { %401 = vrot.lane.b32.xlu1 %v1364_v4, %s1300_s11  ;;  %399 = vrot.lane.b32.xlu0 %v1369_v5, %s1300_s11 }
  0x2e   :  { %413 = vrot.lane.b32.xlu1 %v1380_v6, %s1300_s11  ;;  %411 = vrot.lane.b32.xlu0 %v1385_v7, %s1300_s11 }
  0x32   :  { %272 = vrot.lane.b32.xlu1 %v1364_v4, %s1301_s0  ;;  %270 = vrot.lane.b32.xlu0 %v1369_v5, %s1301_s0 }
  0x36   :  { %276 = vrot.lane.b32.xlu1 %v1357_v3, %s1301_s0  ;;  %274 = vrot.lane.b32.xlu0 %v1345_v1, %s1301_s0 }
  0x3a   :  { %284 = vrot.lane.b32.xlu1 %v1380_v6, %s1301_s0  ;;  %282 = vrot.lane.b32.xlu0 %v1385_v7, %s1301_s0 }
  0x3e   :  { %195 = vrot.lane.b32.xlu1 %v1364_v4, %s1302_s12  ;;  %193 = vrot.lane.b32.xlu0 %v1369_v5, %s1302_s12 }
  0x42   :  { %199 = vrot.lane.b32.xlu1 %v1357_v3, %s1302_s12  ;;  %197 = vrot.lane.b32.xlu0 %v1345_v1, %s1302_s12 }
  0x46   :  { %280 = vrot.lane.b32.xlu1 %v1352_v2, %s1301_s0  ;;  %278 = vrot.lane.b32.xlu0 %v1340_v0, %s1301_s0 }
  0x4a   :  { %207 = vrot.lane.b32.xlu1 %v1380_v6, %s1302_s12  ;;  %205 = vrot.lane.b32.xlu0 %v1385_v7, %s1302_s12 }
  0x4e   :  { %118 = vrot.lane.b32.xlu1 %v1364_v4, %s1303_s13  ;;  %116 = vrot.lane.b32.xlu0 %v1369_v5, %s1303_s13 }
  0x52   :  { %122 = vrot.lane.b32.xlu1 %v1357_v3, %s1303_s13  ;;  %120 = vrot.lane.b32.xlu0 %v1345_v1, %s1303_s13 }
  0x56   :  { %203 = vrot.lane.b32.xlu1 %v1352_v2, %s1302_s12  ;;  %201 = vrot.lane.b32.xlu0 %v1340_v0, %s1302_s12 }
  0x5a   :  { %130 = vrot.lane.b32.xlu1 %v1380_v6, %s1303_s13  ;;  %128 = vrot.lane.b32.xlu0 %v1385_v7, %s1303_s13 }
  0x5e   :  { %39 = vrot.lane.b32.xlu1 %v1364_v4, %s1304_s14  ;;  %37 = vrot.lane.b32.xlu0 %v1369_v5, %s1304_s14 }
  0x62   :  { %43 = vrot.lane.b32.xlu1 %v1357_v3, %s1304_s14  ;;  %41 = vrot.lane.b32.xlu0 %v1345_v1, %s1304_s14 }
  0x66   :  { %126 = vrot.lane.b32.xlu1 %v1352_v2, %s1303_s13  ;;  %124 = vrot.lane.b32.xlu0 %v1340_v0, %s1303_s13 }
  0x6a   :  { %51 = vrot.lane.b32.xlu1 %v1380_v6, %s1304_s14  ;;  %49 = vrot.lane.b32.xlu0 %v1385_v7, %s1304_s14 }
  0x6e   :  { %47 = vrot.lane.b32.xlu1 %v1352_v2, %s1304_s14  ;;  %45 = vrot.lane.b32.xlu0 %v1340_v0, %s1304_s14 }
  0x72   :  { %636 = vrot.lane.b32.xlu1 %v1357_v3, %s1305_s15  ;;  %634 = vrot.lane.b32.xlu0 %v1345_v1, %s1305_s15 }
  0x74   :  { %v562_v13 = vpop.permute.xlu1 %561  ;;  %v558_v14 = vpop.permute.xlu0 %557 }
  0x75   :  { %v572_v17 = vsel %vm569_vm0, %v558_v14, %v562_v13 }
  0x76   :  { %640 = vrot.lane.b32.xlu1 %v1352_v2, %s1305_s15  ;;  %638 = vrot.lane.b32.xlu0 %v1340_v0, %s1305_s15  ;;  %v595_v23 = vmul.f32 %v585_v16, %v572_v17 }
  0x78   :  { %v564_v19 = vpop.permute.xlu1 %563  ;;  %v560_v20 = vpop.permute.xlu0 %559 }
  0x79   :  { %v573_v21 = vsel %vm569_vm0, %v560_v20, %v564_v19 }
  0x7a   :  { %632 = vrot.lane.b32.xlu1 %v1364_v4, %s1305_s15  ;;  %630 = vrot.lane.b32.xlu0 %v1369_v5, %s1305_s15  ;;  %v599_v24 = vmul.f32 %v585_v16, %v573_v21 }
  0x7c   :  { %v556_v25 = vpop.permute.xlu1 %555  ;;  %v554_v26 = vpop.permute.xlu0 %553  ;;  %v1273_v27 = vpack.c.bf16 %v599_v24, %v595_v23 }
  0x7d   :  { %v575_v28 = vsel %vm569_vm0, %v556_v25, %v560_v20  ;;  %v574_v29 = vsel %vm569_vm0, %v554_v26, %v558_v14  ;;  %v426_v14 = vsub.s32 5, %v1433_v9  ;;  %v349_v20 = vsub.s32 4, %v1433_v9 }
  0x7e   :  { %v598_v30 = vmul.f32 %v581_v22, %v575_v28  ;;  %v594_v31 = vmul.f32 %v581_v22, %v574_v29  ;;  %644 = vrot.lane.b32.xlu1 %v1380_v6, %s1305_s15  ;;  %938 = vmatprep.subr.bf16.mxu0 %v1273_v27  ;;  %v512_v27 = vrot.slane %v1484_v37, %v503_v32 }
  0x7f   :  { %642 = vrot.lane.b32.xlu0 %v1385_v7, %s1305_s15  ;;  %v516_v28 = vrot.slane %v1489_v38, %v503_v32  ;;  %v354_v29 = vrot.slane %v1445_v12, %v349_v20 }
  0x80   :  { %v483_v33 = vpop.permute.xlu1 %482  ;;  %v481_v34 = vpop.permute.xlu0 %480  ;;  %v1272_v35 = vpack.c.bf16 %v598_v30, %v594_v31  ;;  %v350_v30 = vrot.slane %v1461_v18, %v349_v20 }
  0x82   :  { %939 = vmatpush1.bf16.msra.mxu0 %v1272_v35  ;;  %v427_v35 = vrot.slane %v1461_v18, %v426_v14 }
  0x84   :  { %v487_v39 = vpop.permute.xlu1 %486  ;;  %v485_v40 = vpop.permute.xlu0 %484 }
  0x85   :  { %v496_v41 = vsel %vm492_vm2, %v483_v33, %v487_v39  ;;  %v495_v42 = vsel %vm492_vm2, %v481_v34, %v485_v40 }
  0x86   :  { %v522_v43 = vmul.f32 %v508_v36, %v496_v41  ;;  %v518_v44 = vmul.f32 %v508_v36, %v495_v42 }
  0x88   :  { %v568_v47 = vpop.permute.xlu1 %567  ;;  %v566_v48 = vpop.permute.xlu0 %565  ;;  %v1269_v49 = vpack.c.bf16 %v522_v43, %v518_v44 }
  0x89   :  { %v571_v51 = vsel %vm569_vm0, %v564_v19, %v568_v47  ;;  %v577_v52 = vsel %vm569_vm0, %v568_v47, %v556_v25  ;;  %v570_v53 = vsel %vm569_vm0, %v562_v13, %v566_v48  ;;  %v576_v54 = vsel %vm569_vm0, %v566_v48, %v554_v26 }
  0x8a   :  { %v600_v55 = vmul.f32 %v589_v45, %v571_v51  ;;  %v596_v56 = vmul.f32 %v589_v45, %v570_v53  ;;  %940 = vmatprep.subr.bf16.mxu0 %v1269_v49  ;;  %v597_v57 = vmul.f32 %v593_v46, %v576_v54  ;;  %v601_v58 = vmul.f32 %v593_v46, %v577_v52 }
  0x8b   :  { %v431_v19 = vrot.slane %v1445_v12, %v426_v14  ;;  %v364_v47 = vmul.f32 %v354_v29, %v1345_v1  ;;  %v368_v48 = vmul.f32 %v354_v29, %v1357_v3  ;;  %v362_v53 = vrot.slane %v1489_v38, %v349_v20 }
  0x8c   :  { %v479_v59 = vpop.permute.xlu1 %478  ;;  %v477_v60 = vpop.permute.xlu0 %476  ;;  %v1275_v61 = vpack.c.bf16 %v601_v58, %v597_v57  ;;  %v1274_v62 = vpack.c.bf16 %v600_v55, %v596_v56  ;;  %v435_v3 = vrot.slane %v1484_v37, %v426_v14  ;;  %v1543_v57 = vsub.s32 3, %v1433_v9 }
  0x8d   :  { %v498_v63 = vsel %vm492_vm2, %v479_v59, %v483_v33  ;;  %v497_v8 = vsel %vm492_vm2, %v477_v60, %v481_v34  ;;  %v358_v58 = vrot.slane %v1484_v37, %v349_v20 }
  0x8e   :  { %v521_v11 = vmul.f32 %v504_v50, %v498_v63  ;;  %v517_v13 = vmul.f32 %v504_v50, %v497_v8  ;;  %981 = vmatprep.subr.bf16.mxu1 %v1275_v61  ;;  %v366_v63 = vmul.f32 %v362_v53, %v1385_v7  ;;  %v370_v8 = vmul.f32 %v362_v53, %v1380_v6 }
  0x8f   :  { %982 = vmatpush1.bf16.msra.mxu1 %v1274_v62  ;;  %v365_v6 = vmul.f32 %v358_v58, %v1340_v0  ;;  %v369_v7 = vmul.f32 %v358_v58, %v1352_v2  ;;  %v306_v53 = vrot.slane %v1484_v37, %v1543_v57 }
  0x90   :  { %v406_v15 = vpop.permute.xlu1 %405  ;;  %v404_v16 = vpop.permute.xlu0 %403  ;;  %v1268_v17 = vpack.c.bf16 %v521_v11, %v517_v13 }
  0x92   :  { %941 = vmatpush1.bf16.msra.mxu0 %v1268_v17 }
  0x94   :  { %v410_v21 = vpop.permute.xlu1 %409  ;;  %v408_v22 = vpop.permute.xlu0 %407 }
  0x95   :  { %v419_v23 = vsel %vm415_vm3, %v406_v15, %v410_v21  ;;  %v418_v24 = vsel %vm415_vm3, %v404_v16, %v408_v22 }
  0x96   :  { %v445_v25 = vmul.f32 %v431_v19, %v419_v23  ;;  %v441_v26 = vmul.f32 %v431_v19, %v418_v24 }
  0x98   :  { %v491_v31 = vpop.permute.xlu1 %490  ;;  %v489_v33 = vpop.permute.xlu0 %488  ;;  %v1265_v34 = vpack.c.bf16 %v445_v25, %v441_v26  ;;  %v1263_v26 = vpack.c.bf16 %v370_v8, %v366_v63 }
  0x99   :  { %v494_v36 = vsel %vm492_vm2, %v487_v39, %v491_v31  ;;  %v500_v41 = vsel %vm492_vm2, %v491_v31, %v479_v59  ;;  %v493_v42 = vsel %vm492_vm2, %v485_v40, %v489_v33  ;;  %v499_v32 = vsel %vm492_vm2, %v489_v33, %v477_v60 }
  0x9a   :  { %v523_v43 = vmul.f32 %v512_v27, %v494_v36  ;;  %v524_v44 = vmul.f32 %v516_v28, %v500_v41  ;;  %v519_v45 = vmul.f32 %v512_v27, %v493_v42  ;;  %v520_v46 = vmul.f32 %v516_v28, %v499_v32  ;;  %942 = vmatprep.subr.bf16.mxu0 %v1265_v34 }
  0x9b   :  { %v363_v39 = vmul.f32 %v350_v30, %v1369_v5  ;;  %v367_v40 = vmul.f32 %v350_v30, %v1364_v4  ;;  %v439_v5 = vrot.slane %v1489_v38, %v426_v14  ;;  %v1261_v4 = vpack.c.bf16 %v368_v48, %v364_v47 }
  0x9c   :  { %v402_v49 = vpop.permute.xlu1 %401  ;;  %v400_v50 = vpop.permute.xlu0 %399  ;;  %v1271_v51 = vpack.c.bf16 %v524_v44, %v520_v46  ;;  %v1270_v52 = vpack.c.bf16 %v523_v43, %v519_v45  ;;  %v1262_v27 = vpack.c.bf16 %v369_v7, %v365_v6  ;;  %v298_v33 = vrot.slane %v1461_v18, %v1543_v57 }
  0x9d   :  { %v421_v54 = vsel %vm415_vm3, %v402_v49, %v406_v15  ;;  %v420_v55 = vsel %vm415_vm3, %v400_v50, %v404_v16  ;;  %v1260_v62 = vpack.c.bf16 %v367_v40, %v363_v39  ;;  %v220_v44 = vsub.s32 2, %v1433_v9 }
  0x9e   :  { %v444_v56 = vmul.f32 %v427_v35, %v421_v54  ;;  %v440_v1 = vmul.f32 %v427_v35, %v420_v55  ;;  %983 = vmatprep.subr.bf16.mxu1 %v1271_v51  ;;  %v310_v54 = vrot.slane %v1489_v38, %v1543_v57 }
  0x9f   :  { %984 = vmatpush1.bf16.msra.mxu1 %v1270_v52  ;;  %v225_v48 = vrot.slane %v1445_v12, %v220_v44 }
  0xa0   :  { %v414_v59 = vpop.permute.xlu1 %413  ;;  %v412_v60 = vpop.permute.xlu0 %411  ;;  %v1264_v61 = vpack.c.bf16 %v444_v56, %v440_v1 }
  0xa1   :  { %v417_v11 = vsel %vm415_vm3, %v410_v21, %v414_v59  ;;  %v423_v13 = vsel %vm415_vm3, %v414_v59, %v402_v49  ;;  %v416_v14 = vsel %vm415_vm3, %v408_v22, %v412_v60  ;;  %v422_v15 = vsel %vm415_vm3, %v412_v60, %v400_v50 }
  0xa2   :  { %v446_v16 = vmul.f32 %v435_v3, %v417_v11  ;;  %v447_v17 = vmul.f32 %v439_v5, %v423_v13  ;;  %v442_v19 = vmul.f32 %v435_v3, %v416_v14  ;;  %v443_v20 = vmul.f32 %v439_v5, %v422_v15  ;;  %943 = vmatpush1.bf16.msra.mxu0 %v1264_v61 }
  0xa3   :  { %944 = vmatprep.subr.bf16.mxu0 %v1261_v4  ;;  %v302_v22 = vrot.slane %v1445_v12, %v1543_v57  ;;  %v221_v3 = vrot.slane %v1461_v18, %v220_v44 }
  0xa4   :  { %v273_v21 = vpop.permute.xlu1 %272  ;;  %v271_v23 = vpop.permute.xlu0 %270  ;;  %v1267_v24 = vpack.c.bf16 %v447_v17, %v443_v20  ;;  %v1266_v25 = vpack.c.bf16 %v446_v16, %v442_v19  ;;  %v143_v19 = vsub.s32 1, %v1433_v9 }
  0xa6   :  { %985 = vmatprep.subr.bf16.mxu1 %v1267_v24  ;;  %945 = vmatpush1.bf16.msra.mxu0 %v1260_v62 }
  0xa7   :  { %986 = vmatpush1.bf16.msra.mxu1 %v1266_v25 }
  0xa8   :  { %v277_v28 = vpop.permute.xlu1 %276  ;;  %v275_v29 = vpop.permute.xlu0 %274  ;;  %987 = vmatprep.subr.bf16.mxu1 %v1263_v26 }
  0xa9   :  { %v292_v0 = vsel %vm286_vm4, %v273_v21, %v277_v28  ;;  %v291_v2 = vsel %vm286_vm4, %v271_v23, %v275_v29 }
  0xaa   :  { %v316_v30 = vmul.f32 %v302_v22, %v292_v0  ;;  %v312_v31 = vmul.f32 %v302_v22, %v291_v2 }
  0xab   :  { %988 = vmatpush1.bf16.msra.mxu1 %v1262_v27 }
  0xac   :  { %v285_v34 = vpop.permute.xlu1 %284  ;;  %v283_v35 = vpop.permute.xlu0 %282  ;;  %v1257_v36 = vpack.c.bf16 %v316_v30, %v312_v31  ;;  %v144_v31 = vrot.slane %v1461_v18, %v143_v19 }
  0xad   :  { %v294_v41 = vsel %vm286_vm4, %v285_v34, %v273_v21  ;;  %v293_v42 = vsel %vm286_vm4, %v283_v35, %v271_v23  ;;  %v148_v21 = vrot.slane %v1445_v12, %v143_v19 }
  0xae   :  { %v315_v32 = vmul.f32 %v298_v33, %v294_v41  ;;  %v311_v43 = vmul.f32 %v298_v33, %v293_v42  ;;  %946 = vmatprep.subr.bf16.mxu0 %v1257_v36 }
  0xb0   :  { %v196_v45 = vpop.permute.xlu1 %195  ;;  %v194_v46 = vpop.permute.xlu0 %193  ;;  %v1256_v47 = vpack.c.bf16 %v315_v32, %v311_v43 }
  0xb2   :  { %947 = vmatpush1.bf16.msra.mxu0 %v1256_v47 }
  0xb4   :  { %v200_v39 = vpop.permute.xlu1 %199  ;;  %v198_v49 = vpop.permute.xlu0 %197 }
  0xb5   :  { %v215_v50 = vsel %vm209_vm5, %v196_v45, %v200_v39  ;;  %v214_v51 = vsel %vm209_vm5, %v194_v46, %v198_v49 }
  0xb6   :  { %v239_v52 = vmul.f32 %v225_v48, %v215_v50  ;;  %v235_v40 = vmul.f32 %v225_v48, %v214_v51 }
  0xb8   :  { %v281_v55 = vpop.permute.xlu1 %280  ;;  %v279_v56 = vpop.permute.xlu0 %278  ;;  %v1253_v1 = vpack.c.bf16 %v239_v52, %v235_v40 }
  0xb9   :  { %v288_v5 = vsel %vm286_vm4, %v281_v55, %v285_v34  ;;  %v290_v4 = vsel %vm286_vm4, %v277_v28, %v281_v55  ;;  %v287_v58 = vsel %vm286_vm4, %v279_v56, %v283_v35  ;;  %v289_v59 = vsel %vm286_vm4, %v275_v29, %v279_v56 }
  0xba   :  { %v317_v60 = vmul.f32 %v306_v53, %v290_v4  ;;  %v318_v61 = vmul.f32 %v310_v54, %v288_v5  ;;  %v313_v57 = vmul.f32 %v306_v53, %v289_v59  ;;  %v314_v62 = vmul.f32 %v310_v54, %v287_v58  ;;  %948 = vmatprep.subr.bf16.mxu0 %v1253_v1 }
  0xbb   :  { %v229_v28 = vrot.slane %v1484_v37, %v220_v44  ;;  %v233_v29 = vrot.slane %v1489_v38, %v220_v44  ;;  %v152_v4 = vrot.slane %v1484_v37, %v143_v19  ;;  %v156_v58 = vrot.slane %v1489_v38, %v143_v19 }
  0xbc   :  { %v208_v63 = vpop.permute.xlu1 %207  ;;  %v206_v8 = vpop.permute.xlu0 %205  ;;  %v1259_v11 = vpack.c.bf16 %v318_v61, %v314_v62  ;;  %v1258_v13 = vpack.c.bf16 %v317_v60, %v313_v57 }
  0xbd   :  { %v217_v14 = vsel %vm209_vm5, %v208_v63, %v196_v45  ;;  %v216_v15 = vsel %vm209_vm5, %v206_v8, %v194_v46 }
  0xbe   :  { %v238_v16 = vmul.f32 %v221_v3, %v217_v14  ;;  %v234_v17 = vmul.f32 %v221_v3, %v216_v15  ;;  %989 = vmatprep.subr.bf16.mxu1 %v1259_v11 }
  0xbf   :  { %990 = vmatpush1.bf16.msra.mxu1 %v1258_v13 }
  0xc0   :  { %v119_v20 = vpop.permute.xlu1 %118  ;;  %v117_v6 = vpop.permute.xlu0 %116  ;;  %v1252_v7 = vpack.c.bf16 %v238_v16, %v234_v17 }
  0xc2   :  { %949 = vmatpush1.bf16.msra.mxu0 %v1252_v7 }
  0xc4   :  { %v123_v23 = vpop.permute.xlu1 %122  ;;  %v121_v24 = vpop.permute.xlu0 %120 }
  0xc5   :  { %v138_v25 = vsel %vm132_vm6, %v119_v20, %v123_v23  ;;  %v137_v26 = vsel %vm132_vm6, %v117_v6, %v121_v24 }
  0xc6   :  { %v162_v22 = vmul.f32 %v148_v21, %v138_v25  ;;  %v158_v27 = vmul.f32 %v148_v21, %v137_v26 }
  0xc8   :  { %v204_v0 = vpop.permute.xlu1 %203  ;;  %v202_v2 = vpop.permute.xlu0 %201  ;;  %v1249_v30 = vpack.c.bf16 %v162_v22, %v158_v27 }
  0xc9   :  { %v211_v33 = vsel %vm209_vm5, %v204_v0, %v208_v63  ;;  %v213_v34 = vsel %vm209_vm5, %v200_v39, %v204_v0  ;;  %v210_v35 = vsel %vm209_vm5, %v202_v2, %v206_v8  ;;  %v212_v36 = vsel %vm209_vm5, %v198_v49, %v202_v2 }
  0xca   :  { %v240_v41 = vmul.f32 %v229_v28, %v213_v34  ;;  %v241_v42 = vmul.f32 %v233_v29, %v211_v33  ;;  %v236_v32 = vmul.f32 %v229_v28, %v212_v36  ;;  %v237_v43 = vmul.f32 %v233_v29, %v210_v35  ;;  %950 = vmatprep.subr.bf16.mxu0 %v1249_v30 }
  0xcb   :  { %v1618_v49 = vsub.s32 0, %v1433_v9 }
  0xcc   :  { %v131_v44 = vpop.permute.xlu1 %130  ;;  %v129_v45 = vpop.permute.xlu0 %128  ;;  %v1255_v46 = vpack.c.bf16 %v241_v42, %v237_v43  ;;  %v1254_v47 = vpack.c.bf16 %v240_v41, %v236_v32  ;;  %v33_v42 = vld [vmem:[%s1764_s1 + $0x20] sm:$0xff] }
  0xcd   :  { %v140_v48 = vsel %vm132_vm6, %v131_v44, %v119_v20  ;;  %v139_v39 = vsel %vm132_vm6, %v129_v45, %v117_v6  ;;  %v71_v54 = vrot.slane %v1445_v12, %v1618_v49  ;;  %v67_v12 = vrot.slane %v1461_v18, %v1618_v49 }
  0xce   :  { %v161_v50 = vmul.f32 %v144_v31, %v140_v48  ;;  %v157_v51 = vmul.f32 %v144_v31, %v139_v39  ;;  %991 = vmatprep.subr.bf16.mxu1 %v1255_v46  ;;  %v34_v31 = vld [vmem:[%s1764_s1 + $0x28] sm:$0xff]  ;;  %v658_v48 = vrot.slane %v33_v42, %v1618_v49  ;;  %v35_v39 = vld [vmem:[%s1764_s1 + $0x30] sm:$0xff] }
  0xcf   :  { %992 = vmatpush1.bf16.msra.mxu1 %v1254_v47  ;;  %v662_v41 = vrot.slane %v34_v31, %v1618_v49 }
  0xd0   :  { %v40_v52 = vpop.permute.xlu1 %39  ;;  %v38_v40 = vpop.permute.xlu0 %37  ;;  %v1248_v53 = vpack.c.bf16 %v161_v50, %v157_v51  ;;  %v36_v50 = vld [vmem:[%s1764_s1 + $0x38] sm:$0xff] }
  0xd2   :  { %951 = vmatpush1.bf16.msra.mxu0 %v1248_v53 }
  0xd4   :  { %v44_v55 = vpop.permute.xlu1 %43  ;;  %v42_v56 = vpop.permute.xlu0 %41 }
  0xd5   :  { %v61_v1 = vsel %vm55_vm7, %v40_v52, %v44_v55  ;;  %v60_v3 = vsel %vm55_vm7, %v38_v40, %v42_v56 }
  0xd6   :  { %v85_v9 = vmul.f32 %v71_v54, %v61_v1  ;;  %v81_v5 = vmul.f32 %v71_v54, %v60_v3  ;;  %v666_v1 = vrot.slane %v35_v39, %v1618_v49  ;;  %v670_v3 = vrot.slane %v36_v50, %v1618_v49 }
  0xd8   :  { %v127_v59 = vpop.permute.xlu1 %126  ;;  %v125_v60 = vpop.permute.xlu0 %124  ;;  %v1245_v61 = vpack.c.bf16 %v85_v9, %v81_v5 }
  0xd9   :  { %v134_v57 = vsel %vm132_vm6, %v127_v59, %v131_v44  ;;  %v136_v62 = vsel %vm132_vm6, %v123_v23, %v127_v59  ;;  %v133_v63 = vsel %vm132_vm6, %v125_v60, %v129_v45  ;;  %v135_v8 = vsel %vm132_vm6, %v121_v24, %v125_v60  ;;  %v1291_v60 = vld [vmem:[%s1765_s2] ss:$8 sps:$4 sm:$0xff]  }
  0xda   :  { %v163_v11 = vmul.f32 %v152_v4, %v136_v62  ;;  %v164_v13 = vmul.f32 %v156_v58, %v134_v57  ;;  %v159_v14 = vmul.f32 %v152_v4, %v135_v8  ;;  %v160_v15 = vmul.f32 %v156_v58, %v133_v63  ;;  %952 = vmatprep.subr.bf16.mxu0 %v1245_v61 }
  0xdb   :  { %v75_v23 = vrot.slane %v1484_v37, %v1618_v49  ;;  %v79_v24 = vrot.slane %v1489_v38, %v1618_v49 }
  0xdc   :  { %v52_v16 = vpop.permute.xlu1 %51  ;;  %v50_v17 = vpop.permute.xlu0 %49  ;;  %v1251_v18 = vpack.c.bf16 %v164_v13, %v160_v15  ;;  %v1250_v19 = vpack.c.bf16 %v163_v11, %v159_v14 }
  0xdd   :  { %v63_v20 = vsel %vm55_vm7, %v52_v16, %v40_v52  ;;  %v62_v6 = vsel %vm55_vm7, %v50_v17, %v38_v40 }
  0xde   :  { %v84_v7 = vmul.f32 %v67_v12, %v63_v20  ;;  %v80_v21 = vmul.f32 %v67_v12, %v62_v6  ;;  %993 = vmatprep.subr.bf16.mxu1 %v1251_v18 }
  0xdf   :  { %994 = vmatpush1.bf16.msra.mxu1 %v1250_v19 }
  0xe0   :  { %v48_v25 = vpop.permute.xlu1 %47  ;;  %v46_v26 = vpop.permute.xlu0 %45  ;;  %v1244_v22 = vpack.c.bf16 %v84_v7, %v80_v21 }
  0xe1   :  { %v57_v27 = vsel %vm55_vm7, %v48_v25, %v52_v16  ;;  %v59_v28 = vsel %vm55_vm7, %v44_v55, %v48_v25  ;;  %v56_v29 = vsel %vm55_vm7, %v46_v26, %v50_v17  ;;  %v58_v0 = vsel %vm55_vm7, %v42_v56, %v46_v26 }
  0xe2   :  { %v86_v37 = vmul.f32 %v75_v23, %v59_v28  ;;  %v87_v2 = vmul.f32 %v79_v24, %v57_v27  ;;  %v82_v30 = vmul.f32 %v75_v23, %v58_v0  ;;  %v83_v38 = vmul.f32 %v79_v24, %v56_v29  ;;  %953 = vmatpush1.bf16.msra.mxu0 %v1244_v22 }
  0xe4   :  { %v637_v33 = vpop.permute.xlu1 %636  ;;  %v635_v34 = vpop.permute.xlu0 %634  ;;  %v1247_v35 = vpack.c.bf16 %v87_v2, %v83_v38  ;;  %v1246_v36 = vpack.c.bf16 %v86_v37, %v82_v30 }
  0xe6   :  { %995 = vmatprep.subr.bf16.mxu1 %v1247_v35  ;;  %v1306_v35 = vmov 0  }
  0xe7   :  { %996 = vmatpush1.bf16.msra.mxu1 %v1246_v36  ;;  %1289 = vset.pattern.permute.xlu1 %v1306_v35 }
  0xe8   :  { %v641_v32 = vpop.permute.xlu1 %640  ;;  %v639_v43 = vpop.permute.xlu0 %638  ;;  %1290 = vset.pattern.permute.xlu0 %v1306_v35 }
  0xe9   :  { %v650_v44 = vsel %vm646_vm8, %v637_v33, %v641_v32  ;;  %v649_v45 = vsel %vm646_vm8, %v635_v34, %v639_v43 }
  0xea   :  { %v676_v46 = vmul.f32 %v662_v41, %v650_v44  ;;  %v672_v47 = vmul.f32 %v662_v41, %v649_v45 }
  0xec   :  { %v633_v51 = vpop.permute.xlu1 %632  ;;  %v631_v52 = vpop.permute.xlu0 %630  ;;  %v1277_v40 = vpack.c.bf16 %v676_v46, %v672_v47 }
  0xed   :  { %v652_v53 = vsel %vm646_vm8, %v633_v51, %v637_v33  ;;  %v651_v54 = vsel %vm646_vm8, %v631_v52, %v635_v34 }
  0xee   :  { %v675_v55 = vmul.f32 %v658_v48, %v652_v53  ;;  %v671_v56 = vmul.f32 %v658_v48, %v651_v54  ;;  %968 = vmatprep.subr.bf16.mxu0 %v1277_v40  ;;  %v1062_v54 = vld [vmem:[%s1766_s3] sm:$0xff] }
  0xf0   :  { %v645_v9 = vpop.permute.xlu1 %644  ;;  %v1276_v5 = vpack.c.bf16 %v675_v55, %v671_v56 }
  0xf1   :  { %v648_v4 = vsel %vm646_vm8, %v641_v32, %v645_v9  ;;  %v654_v58 = vsel %vm646_vm8, %v645_v9, %v633_v51  ;;  %v643_v59 = vpop.permute.xlu0 %642 }
  0xf2   :  { %v677_v61 = vmul.f32 %v666_v1, %v648_v4  ;;  %v678_v12 = vmul.f32 %v670_v3, %v654_v58  ;;  %v647_v57 = vsel %vm646_vm8, %v639_v43, %v643_v59  ;;  %v653_v49 = vsel %vm646_vm8, %v643_v59, %v631_v52  ;;  %969 = vmatpush2.bf16.msra.mxu0 %v1276_v5  ;;  %v1071_v59 = vld [vmem:[%s1767_s4 + $0x8] sm:$0xff] }
  0xf3   :  { %v673_v62 = vmul.f32 %v666_v1, %v647_v57  ;;  %v674_v63 = vmul.f32 %v670_v3, %v653_v49  ;;  %v1070_v1 = vld [vmem:[%s1767_s4] sm:$0xff]  ;;  %v1063_v3 = vld [vmem:[%s1766_s3 + $0x8] sm:$0xff] }
  0xf5   :  { %971 = vmatmul.mubr.bf16.vlgmr.msra.gmra.mxu0 %v1291_v60  ;;  %v1279_v8 = vpack.c.bf16 %v678_v12, %v674_v63  ;;  %v1278_v11 = vpack.c.bf16 %v677_v61, %v673_v62 }
  0xf7   :  { %1011 = vmatprep.subr.bf16.mxu1 %v1279_v8 }
  0xf8   :  { %1012 = vmatpush2.bf16.msra.mxu1 %v1278_v11 }
  0xfb   :  { %1014 = vmatmul.mubr.bf16.vlgmr.msra.gmra.mxu1 %v1291_v60 }
 0x1b5   :  { %v1691_v13 = vpop.f32.mrf.mxu0 }
 0x1b6   :  { %v1036_v14 = vmul.f32 %v1691_v13, %v1691_v13 }
 0x1b7   :  { %v1695_v15 = vpop.f32.mrf.mxu0 }
 0x1b8   :  { %v1024_v10 = vadd.f32 %v1695_v15, %v1691_v13  ;;  %v1037_v16 = vmul.f32 %v1695_v15, %v1695_v15 }
 0x1b9   :  { %v1701_v17 = vpop.f32.mrf.mxu0 }
 0x1ba   :  { %v1044_v18 = vadd.f32 %v1037_v16, %v1036_v14  ;;  %v1040_v19 = vmul.f32 %v1701_v17, %v1701_v17 }
 0x1bb   :  { %v1705_v20 = vpop.f32.mrf.mxu1  ;;  %v1707_v6 = vpop.f32.mrf.mxu0 }
 0x1bc   :  { %v1038_v7 = vmul.f32 %v1705_v20, %v1705_v20  ;;  %v1029_v21 = vadd.f32 %v1707_v6, %v1701_v17  ;;  %v1041_v23 = vmul.f32 %v1707_v6, %v1707_v6  ;;  %v1025_v24 = vadd.f32 %v1024_v10, %v1705_v20 }
 0x1bd   :  { %v1017_v25 = vpop.f32.mrf.mxu1 }
 0x1be   :  { %v1049_v26 = vadd.f32 %v1041_v23, %v1040_v19  ;;  %v1026_v22 = vadd.f32 %v1025_v24, %v1017_v25  ;;  %v1039_v27 = vmul.f32 %v1017_v25, %v1017_v25  ;;  %v1045_v28 = vadd.f32 %v1044_v18, %v1038_v7 }
 0x1bf   :  { %v1716_v29 = vpop.f32.mrf.mxu1 }
 0x1c0   :  { %v1042_v0 = vmul.f32 %v1716_v29, %v1716_v29  ;;  %1027 = vadd.xlane.f32.xlu0 %v1026_v22  ;;  %v1030_v37 = vadd.f32 %v1029_v21, %v1716_v29  ;;  %v1046_v38 = vadd.f32 %v1045_v28, %v1039_v27 }
 0x1c1   :  { %v1021_v2 = vpop.f32.mrf.mxu1 }
 0x1c2   :  { %v1043_v30 = vmul.f32 %v1021_v2, %v1021_v2  ;;  %v1031_v31 = vadd.f32 %v1030_v37, %v1021_v2  ;;  %v1050_v33 = vadd.f32 %v1049_v26, %v1042_v0 }
 0x1c4   :  { %1047 = vadd.xlane.f32.xlu0 %v1046_v38  ;;  %1032 = vadd.xlane.f32.xlu1 %v1031_v31  ;;  %v1051_v34 = vadd.f32 %v1050_v33, %v1043_v30 }
 0x1c8   :  { %1052 = vadd.xlane.f32.xlu0 %v1051_v34 }
 0x249   :  { %v1028_v36 = vpop.xlane.xlu0 %1027 }
 0x24a   :  { %v1034_v41 = vmul.f32 0.001953125, %v1028_v36 }
 0x24c   :  { %v1056_v43 = vmul.f32 %v1034_v41, %v1034_v41 }
 0x24d   :  { %v1048_v42 = vpop.xlane.xlu0 %1047  ;;  %v1033_v32 = vpop.xlane.xlu1 %1032 }
 0x24e   :  { %v1054_v44 = vmul.f32 0.001953125, %v1048_v42  ;;  %v1035_v45 = vmul.f32 0.001953125, %v1033_v32 }
 0x250   :  { %v1058_v46 = vsub.f32 %v1054_v44, %v1056_v43  ;;  %v1057_v39 = vmul.f32 %v1035_v45, %v1035_v45 }
 0x251   :  { %v1053_v47 = vpop.xlane.xlu0 %1052 }
 0x252   :  { %v1060_v48 = vmax.f32 %v1058_v46, 0.0  ;;  %v1055_v50 = vmul.f32 0.001953125, %v1053_v47 }
 0x254   :  { %v1064_v51 = vadd.f32 1e-05, %v1060_v48  ;;  %v1059_v52 = vsub.f32 %v1055_v50, %v1057_v39 }
 0x256   :  { %1294 = vrsqrt.f32 %v1064_v51  ;;  %v1061_v40 = vmax.f32 %v1059_v52, 0.0 }
 0x258   :  { %v1065_v53 = vadd.f32 1e-05, %v1061_v40 }
 0x25a   :  { %1296 = vrsqrt.f32 %v1065_v53 }
 0x263   :  { %v1295_v55 = vpop.eup %1294 }
 0x264   :  { %v1068_v56 = vmul.f32 %v1295_v55, %v1062_v54 }
 0x266   :  { %1078 = vperm.xlu1 %1289, %v1068_v56   ;;  %v1072_v9 = vmul.f32 %v1068_v56, %v1034_v41 }
 0x267   :  { %v1297_v5 = vpop.eup %1296 }
 0x268   :  { %v1074_v4 = vsub.f32 %v1070_v1, %v1072_v9  ;;  %v1069_v58 = vmul.f32 %v1297_v5, %v1063_v3 }
 0x26a   :  { %1096 = vperm.xlu1 %1289, %v1074_v4   ;;  %1083 = vperm.xlu0 %1290, %v1069_v58   ;;  %v1073_v60 = vmul.f32 %v1069_v58, %v1035_v45 }
 0x26c   :  { %v1075_v61 = vsub.f32 %v1071_v59, %v1073_v60 }
 0x26e   :  { %1101 = vperm.xlu1 %1289, %v1075_v61  }
 0x2e1   :  { %v1079_v12 = vpop.permute.xlu1 %1078 }
 0x2e2   :  { %v1086_v57 = vmul.f32 %v1079_v12, %v1691_v13  ;;  %v1087_v49 = vmul.f32 %v1079_v12, %v1695_v15  ;;  %v1088_v62 = vmul.f32 %v1079_v12, %v1705_v20  ;;  %v1089_v63 = vmul.f32 %v1079_v12, %v1017_v25 }
 0x2e5   :  { %v1084_v8 = vpop.permute.xlu0 %1083  ;;  %v1097_v11 = vpop.permute.xlu1 %1096 }
 0x2e6   :  { %v1104_v14 = vadd.f32 %v1097_v11, %v1086_v57  ;;  %v1105_v10 = vadd.f32 %v1097_v11, %v1087_v49  ;;  %v1106_v16 = vadd.f32 %v1097_v11, %v1088_v62  ;;  %v1107_v18 = vadd.f32 %v1097_v11, %v1089_v63 }
 0x2e7   :  { %v1090_v19 = vmul.f32 %v1084_v8, %v1701_v17  ;;  %v1091_v7 = vmul.f32 %v1084_v8, %v1707_v6  ;;  %v1092_v21 = vmul.f32 %v1084_v8, %v1716_v29  ;;  %v1093_v23 = vmul.f32 %v1084_v8, %v1021_v2 }
 0x2e8   :  { %v1112_v24 = vmax.f32 %v1104_v14, 0.0  ;;  %v1113_v13 = vmax.f32 %v1105_v10, 0.0  ;;  %v1114_v26 = vmax.f32 %v1106_v16, 0.0  ;;  %v1115_v15 = vmax.f32 %v1107_v18, 0.0 }
 0x2e9   :  { %v1102_v22 = vpop.permute.xlu1 %1101 }
 0x2ea   :  { %v1108_v20 = vadd.f32 %v1102_v22, %v1090_v19  ;;  %v1109_v25 = vadd.f32 %v1102_v22, %v1091_v7  ;;  %v1110_v27 = vadd.f32 %v1102_v22, %v1092_v21  ;;  %v1111_v28 = vadd.f32 %v1102_v22, %v1093_v23  ;;  %1120 = vst [vmem:[%s1768_s5] sm:$0xff] %v1112_v24 }
 0x2eb   :  { %1121 = vst [vmem:[%s1768_s5 + $0x8] sm:$0xff] %v1113_v13  ;;  %1122 = vst [vmem:[%s1768_s5 + $0x10] sm:$0xff] %v1114_v26 }
 0x2ec   :  { %1123 = vst [vmem:[%s1768_s5 + $0x18] sm:$0xff] %v1115_v15  ;;  %v1116_v17 = vmax.f32 %v1108_v20, 0.0  ;;  %v1117_v6 = vmax.f32 %v1109_v25, 0.0  ;;  %v1118_v29 = vmax.f32 %v1110_v27, 0.0  ;;  %v1119_v0 = vmax.f32 %v1111_v28, 0.0 }
 0x2ee   :  { %1124 = vst [vmem:[%s1768_s5 + $0x20] sm:$0xff] %v1116_v17  ;;  %1125 = vst [vmem:[%s1768_s5 + $0x28] sm:$0xff] %v1117_v6 }
 0x2ef   :  { %1126 = vst [vmem:[%s1768_s5 + $0x30] sm:$0xff] %v1118_v29  ;;  %1127 = vst [vmem:[%s1768_s5 + $0x38] sm:$0xff] %v1119_v0 }

</bundles_post_ra>
